<compile_context>
chip_gen: v5e
topology: v5e:2x2
jax: 0.10.0
libtpu: 0.0.40
codegen_flags: <defaults>
</compile_context>

<pallas_src>
import jax
import jax.numpy as jnp
from jax import lax
from jax.experimental import pallas as pl
from jax.experimental.pallas import tpu as pltpu


def ealstm_kernel(xd_ref, xs_ref, wih_ref, whh_ref, wsh_ref, bias_ref, bias_s_ref,
                  hn_ref, cn_ref,
                  xwf_ref, xwo_ref, xwg_ref):
    """EA-LSTM forward for one batch block, fully inside VMEM.

    xd_ref:     [T, BB, Dd]  dynamic inputs (time-major, batch block)
    xs_ref:     [BB, Ds]     static inputs
    wih_ref:    [3, Dd, H]   input-to-hidden weights, per gate (f, o, g)
    whh_ref:    [3, H, H]    hidden-to-hidden weights, per gate, bf16
    wsh_ref:    [Ds, H]      static-to-hidden weights (input gate)
    bias_ref:   [3, 1, H]    per-gate bias
    bias_s_ref: [1, H]       static-path bias
    hn_ref:     [T, BB, H]   hidden states out
    cn_ref:     [T, BB, H]   cell states out
    xw*_ref:    [T, BB, H]   VMEM scratch: precomputed x projections per gate
    """
    T, BB, Dd = xd_ref.shape
    H = wsh_ref.shape[1]

    # ---------------- one-time work (per batch block) ----------------
    # Static input gate: sigmoid(x_s @ W_sh + bias_s), computed once.
    i_gate = jax.nn.sigmoid(
        jnp.dot(xs_ref[...], wsh_ref[...], preferred_element_type=jnp.float32)
        + bias_s_ref[...])                                            # [BB, H]

    # Batched input projection (bias folded in): one matmul per gate, before the loop.
    xd2 = xd_ref[...].reshape(T * BB, Dd)                             # [T*BB, Dd]
    xwf_ref[...] = (jnp.dot(xd2, wih_ref[0], preferred_element_type=jnp.float32)
                    + bias_ref[0]).reshape(T, BB, H)
    xwo_ref[...] = (jnp.dot(xd2, wih_ref[1], preferred_element_type=jnp.float32)
                    + bias_ref[1]).reshape(T, BB, H)
    xwg_ref[...] = (jnp.dot(xd2, wih_ref[2], preferred_element_type=jnp.float32)
                    + bias_ref[2]).reshape(T, BB, H)

    # Per-gate recurrent weights (leading-axis index = free), kept in bf16 for the MXU.
    whh_f = whh_ref[0]
    whh_o = whh_ref[1]
    whh_g = whh_ref[2]

    # ---------------- serial recurrence ----------------
    def step(t, carry):
        h0, c0 = carry
        h0b = h0.astype(jnp.bfloat16)   # bf16 matmul operands, f32 accumulation
        f = jax.nn.sigmoid(
            xwf_ref[t] + jnp.dot(h0b, whh_f, preferred_element_type=jnp.float32))
        o = jax.nn.sigmoid(
            xwo_ref[t] + jnp.dot(h0b, whh_o, preferred_element_type=jnp.float32))
        g = jnp.tanh(
            xwg_ref[t] + jnp.dot(h0b, whh_g, preferred_element_type=jnp.float32))
        c1 = f * c0 + i_gate * g        # elementwise math stays f32
        h1 = o * jnp.tanh(c1)
        hn_ref[t] = h1
        cn_ref[t] = c1
        return (h1, c1)

    h0 = jnp.zeros((BB, H), jnp.float32)
    c0 = jnp.zeros((BB, H), jnp.float32)
    # T is small and static -> fully unroll so EUP/VPU/MXU work can interleave.
    lax.fori_loop(0, T, step, (h0, c0), unroll=True)


def model_forward(x_d, x_s, params, *, block_b=None):
    """Equivalent of Model.forward(x_d, x_s) (concat_static=False, no_static=False).

    x_d: [B, T, Dd] float32 (batch_first, like the PyTorch module)
    x_s: [B, Ds]    float32
    returns (out [B,T,1], h_n [B,T,H], c_n [B,T,H])
    """
    B, T, Dd = x_d.shape
    Ds = x_s.shape[1]
    H = params["weight_hh"].shape[0]

    if block_b is None:
        block_b = 8 if (B % 8 == 0) else B
    assert B % block_b == 0, "batch must be divisible by the batch block"

    # Time-major dynamic inputs for the kernel.
    xd_tm = jnp.transpose(x_d.astype(jnp.float32), (1, 0, 2))         # [T, B, Dd]
    xs = x_s.astype(jnp.float32)

    def split3(w, axis):
        return jnp.stack(jnp.split(w, 3, axis=axis), axis=0)

    # Pre-split per-gate parameter stacks (free at the XLA level).
    wih3 = split3(params["weight_ih"].astype(jnp.float32), axis=1)            # [3, Dd, H]
    whh3 = split3(params["weight_hh"].astype(jnp.float32), axis=1)            # [3, H, H]
    whh3 = whh3.astype(jnp.bfloat16)                                          # MXU-native
    bias3 = split3(params["bias"].reshape(1, -1).astype(jnp.float32), axis=1)  # [3, 1, H]
    wsh = params["weight_sh"].astype(jnp.float32)                             # [Ds, H]
    bias_s = params["bias_s"].reshape(1, -1).astype(jnp.float32)              # [1, H]

    grid = (B // block_b,)

    hn_t, cn_t = pl.pallas_call(
        ealstm_kernel,
        out_shape=(jax.ShapeDtypeStruct((T, B, H), jnp.float32),
                   jax.ShapeDtypeStruct((T, B, H), jnp.float32)),
        grid=grid,
        in_specs=[
            pl.BlockSpec((T, block_b, Dd), lambda b: (0, b, 0)),   # x_d (batch-blocked)
            pl.BlockSpec((block_b, Ds), lambda b: (b, 0)),         # x_s (batch-blocked)
            pl.BlockSpec((3, Dd, H), lambda b: (0, 0, 0)),         # W_ih per gate
            pl.BlockSpec((3, H, H), lambda b: (0, 0, 0)),          # W_hh per gate (bf16)
            pl.BlockSpec((Ds, H), lambda b: (0, 0)),               # W_sh
            pl.BlockSpec((3, 1, H), lambda b: (0, 0, 0)),          # bias per gate
            pl.BlockSpec((1, H), lambda b: (0, 0)),                # bias_s
        ],
        out_specs=(pl.BlockSpec((T, block_b, H), lambda b: (0, b, 0)),
                   pl.BlockSpec((T, block_b, H), lambda b: (0, b, 0))),
        scratch_shapes=[
            pltpu.VMEM((T, block_b, H), jnp.float32),   # x-projection, forget gate
            pltpu.VMEM((T, block_b, H), jnp.float32),   # x-projection, output gate
            pltpu.VMEM((T, block_b, H), jnp.float32),   # x-projection, cell candidate
        ],
        compiler_params=pltpu.CompilerParams(
            dimension_semantics=("parallel",)),         # batch blocks are independent
    )(xd_tm, xs, wih3, whh3, wsh, bias3, bias_s)

    h_n = jnp.transpose(hn_t, (1, 0, 2))   # [B, T, H]
    c_n = jnp.transpose(cn_t, (1, 0, 2))   # [B, T, H]

    # dropout(p=0.0) is an identity; FC head is a lane-dense batched matmul in XLA
    # (kept out of the kernel to avoid a lane-width-1 masked store per timestep).
    out = h_n @ params["fc_w"].T.astype(jnp.float32) + params["fc_b"].astype(jnp.float32)
    return out, h_n, c_n


def init_params(key, input_size_dyn, input_size_stat, hidden_size,
                initial_forget_bias=5):
    """Deterministic parameter init mirroring EALSTM.reset_parameters + nn.Linear."""
    k1, k2, k3, k4 = jax.random.split(key, 4)
    H = hidden_size

    # orthogonal-ish init via QR of a gaussian (deterministic given the key)
    def ortho(k, shape):
        a = jax.random.normal(k, (max(shape), max(shape)), jnp.float32)
        q, _ = jnp.linalg.qr(a)
        return q[:shape[0], :shape[1]].astype(jnp.float32)

    weight_ih = ortho(k1, (input_size_dyn, 3 * H))
    weight_sh = ortho(k2, (input_size_stat, H))
    weight_hh = jnp.tile(jnp.eye(H, dtype=jnp.float32), (1, 3))   # eye repeated (1,3)
    bias = jnp.zeros((3 * H,), jnp.float32)
    bias = bias.at[:H].set(float(initial_forget_bias))            # forget bias = 5
    bias_s = jnp.zeros((H,), jnp.float32)

    fc_w = jax.random.normal(k3, (1, H), jnp.float32) * (1.0 / jnp.sqrt(H))
    fc_b = jax.random.normal(k4, (1,), jnp.float32) * 0.01

    return dict(weight_ih=weight_ih, weight_hh=weight_hh, weight_sh=weight_sh,
                bias=bias, bias_s=bias_s, fc_w=fc_w, fc_b=fc_b)


def reference_forward(x_d, x_s, params):
    """Pure-JAX f32 reference of the PyTorch Model.forward (for verification)."""
    B, T, Dd = x_d.shape
    H = params["weight_hh"].shape[0]
    i_gate = jax.nn.sigmoid(x_s @ params["weight_sh"] + params["bias_s"][None, :])
    h = jnp.zeros((B, H), jnp.float32)
    c = jnp.zeros((B, H), jnp.float32)
    hs, cs = [], []
    for t in range(T):
        gates = (params["bias"][None, :]
                 + h @ params["weight_hh"]
                 + x_d[:, t, :] @ params["weight_ih"])
        f, o, g = gates[:, :H], gates[:, H:2 * H], gates[:, 2 * H:]
        c = jax.nn.sigmoid(f) * c + i_gate * jnp.tanh(g)
        h = jax.nn.sigmoid(o) * jnp.tanh(c)
        hs.append(h)
        cs.append(c)
    h_n = jnp.stack(hs, axis=1)
    c_n = jnp.stack(cs, axis=1)
    out = h_n @ params["fc_w"].T + params["fc_b"]
    return out, h_n, c_n


if __name__ == "__main__":
    # Shapes implied by the module: n_features=5 dynamic, n_static_feats=4 static.
    B, T = 8, 8
    Dd, Ds, H = 5, 4, 32

    key = jax.random.PRNGKey(0)
    kx, ks, kp = jax.random.split(key, 3)
    x_d = jax.random.normal(kx, (B, T, Dd), jnp.float32)
    x_s = jax.random.normal(ks, (B, Ds), jnp.float32)
    params = init_params(kp, Dd, Ds, H, initial_forget_bias=5)

    out, h_n, c_n = model_forward(x_d, x_s, params)
    jax.block_until_ready((out, h_n, c_n))

    # Verify against the pure-f32 reference of the PyTorch semantics.
    # Tolerance loosened slightly because the in-loop h @ W_hh dots use bf16 operands.
    out_r, hn_r, cn_r = reference_forward(x_d, x_s, params)
    assert out.shape == (B, T, 1) and h_n.shape == (B, T, H) and c_n.shape == (B, T, H)
    assert jnp.allclose(out, out_r, atol=2e-2, rtol=2e-2)
    assert jnp.allclose(h_n, hn_r, atol=2e-2, rtol=2e-2)
    assert jnp.allclose(c_n, cn_r, atol=2e-2, rtol=2e-2)

    print("KERNEL_OK")
</pallas_src>

<mosaic_0001>
module attributes {stable_mosaic.version = 11 : i64} {
  func.func @ealstm_kernel(%arg0: i32, %arg1: memref<8x8x5xf32, #tpu.memory_space<vmem>>, %arg2: memref<8x4xf32, #tpu.memory_space<vmem>>, %arg3: memref<3x5x32xf32, #tpu.memory_space<vmem>>, %arg4: memref<3x32x32xbf16, #tpu.memory_space<vmem>>, %arg5: memref<4x32xf32, #tpu.memory_space<vmem>>, %arg6: memref<3x1x32xf32, #tpu.memory_space<vmem>>, %arg7: memref<1x32xf32, #tpu.memory_space<vmem>>, %arg8: memref<8x8x32xf32, #tpu.memory_space<vmem>>, %arg9: memref<8x8x32xf32, #tpu.memory_space<vmem>>, %arg10: memref<8x8x32xf32, #tpu.memory_space<vmem>>, %arg11: memref<8x8x32xf32, #tpu.memory_space<vmem>>, %arg12: memref<8x8x32xf32, #tpu.memory_space<vmem>>) attributes {dimension_semantics = [#tpu.dimension_semantics<parallel>], iteration_bounds = array<i64: 1>, scalar_prefetch = 0 : i64, scratch_operands = 3 : i64, tpu.core_type = #tpu.core_type<tc>, window_params = [{transform_indices = @transform_0, window_bounds = array<i64: 8, 8, 5>}, {transform_indices = @transform_1, window_bounds = array<i64: 8, 4>}, {pipeline_mode = #tpu.pipeline_mode<synchronous>, transform_indices = @transform_2, window_bounds = array<i64: 3, 5, 32>}, {pipeline_mode = #tpu.pipeline_mode<synchronous>, transform_indices = @transform_3, window_bounds = array<i64: 3, 32, 32>}, {pipeline_mode = #tpu.pipeline_mode<synchronous>, transform_indices = @transform_4, window_bounds = array<i64: 4, 32>}, {pipeline_mode = #tpu.pipeline_mode<synchronous>, transform_indices = @transform_5, window_bounds = array<i64: 3, 1, 32>}, {pipeline_mode = #tpu.pipeline_mode<synchronous>, transform_indices = @transform_6, window_bounds = array<i64: 1, 32>}, {transform_indices = @transform_7, window_bounds = array<i64: 8, 8, 32>}, {transform_indices = @transform_8, window_bounds = array<i64: 8, 8, 32>}]} {
    %c0 = arith.constant 0 : index
    %c0_0 = arith.constant 0 : index
    %0 = vector.load %arg2[%c0, %c0_0] : memref<8x4xf32, #tpu.memory_space<vmem>>, vector<8x4xf32>
    %c0_1 = arith.constant 0 : index
    %c0_2 = arith.constant 0 : index
    %1 = vector.load %arg5[%c0_1, %c0_2] : memref<4x32xf32, #tpu.memory_space<vmem>>, vector<4x32xf32>
    %cst = arith.constant dense<0.000000e+00> : vector<8x32xf32>
    %2 = tpu.matmul %0, %1, %cst {dimension_numbers = #tpu.dot_dimension_numbers<[1], [0], [0], [1], [0, 0, 1, 1], [], []>} : vector<8x4xf32>, vector<4x32xf32>, vector<8x32xf32> -> vector<8x32xf32>
    %c0_3 = arith.constant 0 : index
    %c0_4 = arith.constant 0 : index
    %3 = vector.load %arg7[%c0_3, %c0_4] : memref<1x32xf32, #tpu.memory_space<vmem>>, vector<1x32xf32>
    %4 = vector.broadcast %3 : vector<1x32xf32> to vector<8x32xf32>
    %5 = arith.addf %2, %4 : vector<8x32xf32>
    %6 = arith.negf %5 : vector<8x32xf32>
    %7 = math.exp %6 : vector<8x32xf32>
    %cst_5 = arith.constant 1.000000e+00 : f32
    %8 = vector.broadcast %cst_5 : f32 to vector<8x32xf32>
    %9 = arith.addf %8, %7 : vector<8x32xf32>
    %10 = arith.divf %8, %9 : vector<8x32xf32>
    %c0_6 = arith.constant 0 : index
    %c0_7 = arith.constant 0 : index
    %c0_8 = arith.constant 0 : index
    %11 = vector.load %arg1[%c0_6, %c0_7, %c0_8] : memref<8x8x5xf32, #tpu.memory_space<vmem>>, vector<8x8x5xf32>
    %12 = vector.shape_cast %11 : vector<8x8x5xf32> to vector<64x5xf32>
    %c0_9 = arith.constant 0 : index
    %c0_10 = arith.constant 0 : index
    %c0_11 = arith.constant 0 : index
    %13 = vector.load %arg3[%c0_9, %c0_10, %c0_11] : memref<3x5x32xf32, #tpu.memory_space<vmem>>, vector<1x5x32xf32>
    %14 = vector.shape_cast %13 : vector<1x5x32xf32> to vector<5x32xf32>
    %cst_12 = arith.constant dense<0.000000e+00> : vector<64x32xf32>
    %15 = tpu.matmul %12, %14, %cst_12 {dimension_numbers = #tpu.dot_dimension_numbers<[1], [0], [0], [1], [0, 0, 1, 1], [], []>} : vector<64x5xf32>, vector<5x32xf32>, vector<64x32xf32> -> vector<64x32xf32>
    %c0_13 = arith.constant 0 : index
    %c0_14 = arith.constant 0 : index
    %c0_15 = arith.constant 0 : index
    %16 = vector.load %arg6[%c0_13, %c0_14, %c0_15] : memref<3x1x32xf32, #tpu.memory_space<vmem>>, vector<1x1x32xf32>
    %17 = vector.shape_cast %16 : vector<1x1x32xf32> to vector<1x32xf32>
    %18 = vector.broadcast %17 : vector<1x32xf32> to vector<64x32xf32>
    %19 = arith.addf %15, %18 : vector<64x32xf32>
    %20 = vector.shape_cast %19 : vector<64x32xf32> to vector<8x8x32xf32>
    %c0_16 = arith.constant 0 : index
    %c0_17 = arith.constant 0 : index
    %c0_18 = arith.constant 0 : index
    %21 = vector.load %arg10[%c0_16, %c0_17, %c0_18] : memref<8x8x32xf32, #tpu.memory_space<vmem>>, vector<8x8x32xf32>
    tpu.vector_store %arg10[%c0_16, %c0_17, %c0_18], %20 {strides = array<i32>} : memref<8x8x32xf32, #tpu.memory_space<vmem>>, vector<8x8x32xf32>,
    %c1 = arith.constant 1 : index
    %c0_19 = arith.constant 0 : index
    %c0_20 = arith.constant 0 : index
    %22 = vector.load %arg3[%c1, %c0_19, %c0_20] : memref<3x5x32xf32, #tpu.memory_space<vmem>>, vector<1x5x32xf32>
    %23 = vector.shape_cast %22 : vector<1x5x32xf32> to vector<5x32xf32>
    %cst_21 = arith.constant dense<0.000000e+00> : vector<64x32xf32>
    %24 = tpu.matmul %12, %23, %cst_21 {dimension_numbers = #tpu.dot_dimension_numbers<[1], [0], [0], [1], [0, 0, 1, 1], [], []>} : vector<64x5xf32>, vector<5x32xf32>, vector<64x32xf32> -> vector<64x32xf32>
    %c1_22 = arith.constant 1 : index
    %c0_23 = arith.constant 0 : index
    %c0_24 = arith.constant 0 : index
    %25 = vector.load %arg6[%c1_22, %c0_23, %c0_24] : memref<3x1x32xf32, #tpu.memory_space<vmem>>, vector<1x1x32xf32>
    %26 = vector.shape_cast %25 : vector<1x1x32xf32> to vector<1x32xf32>
    %27 = vector.broadcast %26 : vector<1x32xf32> to vector<64x32xf32>
    %28 = arith.addf %24, %27 : vector<64x32xf32>
    %29 = vector.shape_cast %28 : vector<64x32xf32> to vector<8x8x32xf32>
    %c0_25 = arith.constant 0 : index
    %c0_26 = arith.constant 0 : index
    %c0_27 = arith.constant 0 : index
    %30 = vector.load %arg11[%c0_25, %c0_26, %c0_27] : memref<8x8x32xf32, #tpu.memory_space<vmem>>, vector<8x8x32xf32>
    tpu.vector_store %arg11[%c0_25, %c0_26, %c0_27], %29 {strides = array<i32>} : memref<8x8x32xf32, #tpu.memory_space<vmem>>, vector<8x8x32xf32>,
    %c2 = arith.constant 2 : index
    %c0_28 = arith.constant 0 : index
    %c0_29 = arith.constant 0 : index
    %31 = vector.load %arg3[%c2, %c0_28, %c0_29] : memref<3x5x32xf32, #tpu.memory_space<vmem>>, vector<1x5x32xf32>
    %32 = vector.shape_cast %31 : vector<1x5x32xf32> to vector<5x32xf32>
    %cst_30 = arith.constant dense<0.000000e+00> : vector<64x32xf32>
    %33 = tpu.matmul %12, %32, %cst_30 {dimension_numbers = #tpu.dot_dimension_numbers<[1], [0], [0], [1], [0, 0, 1, 1], [], []>} : vector<64x5xf32>, vector<5x32xf32>, vector<64x32xf32> -> vector<64x32xf32>
    %c2_31 = arith.constant 2 : index
    %c0_32 = arith.constant 0 : index
    %c0_33 = arith.constant 0 : index
    %34 = vector.load %arg6[%c2_31, %c0_32, %c0_33] : memref<3x1x32xf32, #tpu.memory_space<vmem>>, vector<1x1x32xf32>
    %35 = vector.shape_cast %34 : vector<1x1x32xf32> to vector<1x32xf32>
    %36 = vector.broadcast %35 : vector<1x32xf32> to vector<64x32xf32>
    %37 = arith.addf %33, %36 : vector<64x32xf32>
    %38 = vector.shape_cast %37 : vector<64x32xf32> to vector<8x8x32xf32>
    %c0_34 = arith.constant 0 : index
    %c0_35 = arith.constant 0 : index
    %c0_36 = arith.constant 0 : index
    %39 = vector.load %arg12[%c0_34, %c0_35, %c0_36] : memref<8x8x32xf32, #tpu.memory_space<vmem>>, vector<8x8x32xf32>
    tpu.vector_store %arg12[%c0_34, %c0_35, %c0_36], %38 {strides = array<i32>} : memref<8x8x32xf32, #tpu.memory_space<vmem>>, vector<8x8x32xf32>,
    %c0_37 = arith.constant 0 : index
    %c0_38 = arith.constant 0 : index
    %c0_39 = arith.constant 0 : index
    %40 = vector.load %arg4[%c0_37, %c0_38, %c0_39] : memref<3x32x32xbf16, #tpu.memory_space<vmem>>, vector<1x32x32xbf16>
    %41 = vector.shape_cast %40 : vector<1x32x32xbf16> to vector<32x32xbf16>
    %c1_40 = arith.constant 1 : index
    %c0_41 = arith.constant 0 : index
    %c0_42 = arith.constant 0 : index
    %42 = vector.load %arg4[%c1_40, %c0_41, %c0_42] : memref<3x32x32xbf16, #tpu.memory_space<vmem>>, vector<1x32x32xbf16>
    %43 = vector.shape_cast %42 : vector<1x32x32xbf16> to vector<32x32xbf16>
    %c2_43 = arith.constant 2 : index
    %c0_44 = arith.constant 0 : index
    %c0_45 = arith.constant 0 : index
    %44 = vector.load %arg4[%c2_43, %c0_44, %c0_45] : memref<3x32x32xbf16, #tpu.memory_space<vmem>>, vector<1x32x32xbf16>
    %45 = vector.shape_cast %44 : vector<1x32x32xbf16> to vector<32x32xbf16>
    %cst_46 = arith.constant 0.000000e+00 : f32
    %46 = vector.broadcast %cst_46 : f32 to vector<8x32xf32>
    %cst_47 = arith.constant 0.000000e+00 : f32
    %47 = vector.broadcast %cst_47 : f32 to vector<8x32xf32>
    %c0_i32 = arith.constant 0 : i32
    %48 = arith.truncf %46 : vector<8x32xf32> to vector<8x32xbf16>
    %49 = arith.index_cast %c0_i32 : i32 to index
    %c0_48 = arith.constant 0 : index
    %c0_49 = arith.constant 0 : index
    %50 = vector.load %arg10[%49, %c0_48, %c0_49] : memref<8x8x32xf32, #tpu.memory_space<vmem>>, vector<1x8x32xf32>
    %51 = vector.shape_cast %50 : vector<1x8x32xf32> to vector<8x32xf32>
    %cst_50 = arith.constant dense<0.000000e+00> : vector<8x32xf32>
    %52 = tpu.matmul %48, %41, %cst_50 {dimension_numbers = #tpu.dot_dimension_numbers<[1], [0], [0], [1], [0, 0, 1, 1], [], []>} : vector<8x32xbf16>, vector<32x32xbf16>, vector<8x32xf32> -> vector<8x32xf32>
    %53 = arith.addf %51, %52 : vector<8x32xf32>
    %54 = arith.negf %53 : vector<8x32xf32>
    %55 = math.exp %54 : vector<8x32xf32>
    %cst_51 = arith.constant 1.000000e+00 : f32
    %56 = vector.broadcast %cst_51 : f32 to vector<8x32xf32>
    %57 = arith.addf %56, %55 : vector<8x32xf32>
    %58 = arith.divf %56, %57 : vector<8x32xf32>
    %59 = arith.index_cast %c0_i32 : i32 to index
    %c0_52 = arith.constant 0 : index
    %c0_53 = arith.constant 0 : index
    %60 = vector.load %arg11[%59, %c0_52, %c0_53] : memref<8x8x32xf32, #tpu.memory_space<vmem>>, vector<1x8x32xf32>
    %61 = vector.shape_cast %60 : vector<1x8x32xf32> to vector<8x32xf32>
    %cst_54 = arith.constant dense<0.000000e+00> : vector<8x32xf32>
    %62 = tpu.matmul %48, %43, %cst_54 {dimension_numbers = #tpu.dot_dimension_numbers<[1], [0], [0], [1], [0, 0, 1, 1], [], []>} : vector<8x32xbf16>, vector<32x32xbf16>, vector<8x32xf32> -> vector<8x32xf32>
    %63 = arith.addf %61, %62 : vector<8x32xf32>
    %64 = arith.negf %63 : vector<8x32xf32>
    %65 = math.exp %64 : vector<8x32xf32>
    %cst_55 = arith.constant 1.000000e+00 : f32
    %66 = vector.broadcast %cst_55 : f32 to vector<8x32xf32>
    %67 = arith.addf %66, %65 : vector<8x32xf32>
    %68 = arith.divf %66, %67 : vector<8x32xf32>
    %69 = arith.index_cast %c0_i32 : i32 to index
    %c0_56 = arith.constant 0 : index
    %c0_57 = arith.constant 0 : index
    %70 = vector.load %arg12[%69, %c0_56, %c0_57] : memref<8x8x32xf32, #tpu.memory_space<vmem>>, vector<1x8x32xf32>
    %71 = vector.shape_cast %70 : vector<1x8x32xf32> to vector<8x32xf32>
    %cst_58 = arith.constant dense<0.000000e+00> : vector<8x32xf32>
    %72 = tpu.matmul %48, %45, %cst_58 {dimension_numbers = #tpu.dot_dimension_numbers<[1], [0], [0], [1], [0, 0, 1, 1], [], []>} : vector<8x32xbf16>, vector<32x32xbf16>, vector<8x32xf32> -> vector<8x32xf32>
    %73 = arith.addf %71, %72 : vector<8x32xf32>
    %74 = math.tanh %73 : vector<8x32xf32>
    %75 = arith.mulf %58, %47 : vector<8x32xf32>
    %76 = arith.mulf %10, %74 : vector<8x32xf32>
    %77 = arith.addf %75, %76 : vector<8x32xf32>
    %78 = math.tanh %77 : vector<8x32xf32>
    %79 = arith.mulf %68, %78 : vector<8x32xf32>
    %80 = arith.index_cast %c0_i32 : i32 to index
    %c0_59 = arith.constant 0 : index
    %c0_60 = arith.constant 0 : index
    %81 = vector.load %arg8[%80, %c0_59, %c0_60] : memref<8x8x32xf32, #tpu.memory_space<vmem>>, vector<1x8x32xf32>
    %82 = vector.shape_cast %81 : vector<1x8x32xf32> to vector<8x32xf32>
    %83 = vector.shape_cast %79 : vector<8x32xf32> to vector<1x8x32xf32>
    tpu.vector_store %arg8[%80, %c0_59, %c0_60], %83 {strides = array<i32>} : memref<8x8x32xf32, #tpu.memory_space<vmem>>, vector<1x8x32xf32>,
    %84 = arith.index_cast %c0_i32 : i32 to index
    %c0_61 = arith.constant 0 : index
    %c0_62 = arith.constant 0 : index
    %85 = vector.load %arg9[%84, %c0_61, %c0_62] : memref<8x8x32xf32, #tpu.memory_space<vmem>>, vector<1x8x32xf32>
    %86 = vector.shape_cast %85 : vector<1x8x32xf32> to vector<8x32xf32>
    %87 = vector.shape_cast %77 : vector<8x32xf32> to vector<1x8x32xf32>
    tpu.vector_store %arg9[%84, %c0_61, %c0_62], %87 {strides = array<i32>} : memref<8x8x32xf32, #tpu.memory_space<vmem>>, vector<1x8x32xf32>,
    %c1_i32 = arith.constant 1 : i32
    %88 = arith.truncf %79 : vector<8x32xf32> to vector<8x32xbf16>
    %89 = arith.index_cast %c1_i32 : i32 to index
    %c0_63 = arith.constant 0 : index
    %c0_64 = arith.constant 0 : index
    %90 = vector.load %arg10[%89, %c0_63, %c0_64] : memref<8x8x32xf32, #tpu.memory_space<vmem>>, vector<1x8x32xf32>
    %91 = vector.shape_cast %90 : vector<1x8x32xf32> to vector<8x32xf32>
    %cst_65 = arith.constant dense<0.000000e+00> : vector<8x32xf32>
    %92 = tpu.matmul %88, %41, %cst_65 {dimension_numbers = #tpu.dot_dimension_numbers<[1], [0], [0], [1], [0, 0, 1, 1], [], []>} : vector<8x32xbf16>, vector<32x32xbf16>, vector<8x32xf32> -> vector<8x32xf32>
    %93 = arith.addf %91, %92 : vector<8x32xf32>
    %94 = arith.negf %93 : vector<8x32xf32>
    %95 = math.exp %94 : vector<8x32xf32>
    %cst_66 = arith.constant 1.000000e+00 : f32
    %96 = vector.broadcast %cst_66 : f32 to vector<8x32xf32>
    %97 = arith.addf %96, %95 : vector<8x32xf32>
    %98 = arith.divf %96, %97 : vector<8x32xf32>
    %99 = arith.index_cast %c1_i32 : i32 to index
    %c0_67 = arith.constant 0 : index
    %c0_68 = arith.constant 0 : index
    %100 = vector.load %arg11[%99, %c0_67, %c0_68] : memref<8x8x32xf32, #tpu.memory_space<vmem>>, vector<1x8x32xf32>
    %101 = vector.shape_cast %100 : vector<1x8x32xf32> to vector<8x32xf32>
    %cst_69 = arith.constant dense<0.000000e+00> : vector<8x32xf32>
    %102 = tpu.matmul %88, %43, %cst_69 {dimension_numbers = #tpu.dot_dimension_numbers<[1], [0], [0], [1], [0, 0, 1, 1], [], []>} : vector<8x32xbf16>, vector<32x32xbf16>, vector<8x32xf32> -> vector<8x32xf32>
    %103 = arith.addf %101, %102 : vector<8x32xf32>
    %104 = arith.negf %103 : vector<8x32xf32>
    %105 = math.exp %104 : vector<8x32xf32>
    %cst_70 = arith.constant 1.000000e+00 : f32
    %106 = vector.broadcast %cst_70 : f32 to vector<8x32xf32>
    %107 = arith.addf %106, %105 : vector<8x32xf32>
    %108 = arith.divf %106, %107 : vector<8x32xf32>
    %109 = arith.index_cast %c1_i32 : i32 to index
    %c0_71 = arith.constant 0 : index
    %c0_72 = arith.constant 0 : index
    %110 = vector.load %arg12[%109, %c0_71, %c0_72] : memref<8x8x32xf32, #tpu.memory_space<vmem>>, vector<1x8x32xf32>
    %111 = vector.shape_cast %110 : vector<1x8x32xf32> to vector<8x32xf32>
    %cst_73 = arith.constant dense<0.000000e+00> : vector<8x32xf32>
    %112 = tpu.matmul %88, %45, %cst_73 {dimension_numbers = #tpu.dot_dimension_numbers<[1], [0], [0], [1], [0, 0, 1, 1], [], []>} : vector<8x32xbf16>, vector<32x32xbf16>, vector<8x32xf32> -> vector<8x32xf32>
    %113 = arith.addf %111, %112 : vector<8x32xf32>
    %114 = math.tanh %113 : vector<8x32xf32>
    %115 = arith.mulf %98, %77 : vector<8x32xf32>
    %116 = arith.mulf %10, %114 : vector<8x32xf32>
    %117 = arith.addf %115, %116 : vector<8x32xf32>
    %118 = math.tanh %117 : vector<8x32xf32>
    %119 = arith.mulf %108, %118 : vector<8x32xf32>
    %120 = arith.index_cast %c1_i32 : i32 to index
    %c0_74 = arith.constant 0 : index
    %c0_75 = arith.constant 0 : index
    %121 = vector.load %arg8[%120, %c0_74, %c0_75] : memref<8x8x32xf32, #tpu.memory_space<vmem>>, vector<1x8x32xf32>
    %122 = vector.shape_cast %121 : vector<1x8x32xf32> to vector<8x32xf32>
    %123 = vector.shape_cast %119 : vector<8x32xf32> to vector<1x8x32xf32>
    tpu.vector_store %arg8[%120, %c0_74, %c0_75], %123 {strides = array<i32>} : memref<8x8x32xf32, #tpu.memory_space<vmem>>, vector<1x8x32xf32>,
    %124 = arith.index_cast %c1_i32 : i32 to index
    %c0_76 = arith.constant 0 : index
    %c0_77 = arith.constant 0 : index
    %125 = vector.load %arg9[%124, %c0_76, %c0_77] : memref<8x8x32xf32, #tpu.memory_space<vmem>>, vector<1x8x32xf32>
    %126 = vector.shape_cast %125 : vector<1x8x32xf32> to vector<8x32xf32>
    %127 = vector.shape_cast %117 : vector<8x32xf32> to vector<1x8x32xf32>
    tpu.vector_store %arg9[%124, %c0_76, %c0_77], %127 {strides = array<i32>} : memref<8x8x32xf32, #tpu.memory_space<vmem>>, vector<1x8x32xf32>,
    %c2_i32 = arith.constant 2 : i32
    %128 = arith.truncf %119 : vector<8x32xf32> to vector<8x32xbf16>
    %129 = arith.index_cast %c2_i32 : i32 to index
    %c0_78 = arith.constant 0 : index
    %c0_79 = arith.constant 0 : index
    %130 = vector.load %arg10[%129, %c0_78, %c0_79] : memref<8x8x32xf32, #tpu.memory_space<vmem>>, vector<1x8x32xf32>
    %131 = vector.shape_cast %130 : vector<1x8x32xf32> to vector<8x32xf32>
    %cst_80 = arith.constant dense<0.000000e+00> : vector<8x32xf32>
    %132 = tpu.matmul %128, %41, %cst_80 {dimension_numbers = #tpu.dot_dimension_numbers<[1], [0], [0], [1], [0, 0, 1, 1], [], []>} : vector<8x32xbf16>, vector<32x32xbf16>, vector<8x32xf32> -> vector<8x32xf32>
    %133 = arith.addf %131, %132 : vector<8x32xf32>
    %134 = arith.negf %133 : vector<8x32xf32>
    %135 = math.exp %134 : vector<8x32xf32>
    %cst_81 = arith.constant 1.000000e+00 : f32
    %136 = vector.broadcast %cst_81 : f32 to vector<8x32xf32>
    %137 = arith.addf %136, %135 : vector<8x32xf32>
    %138 = arith.divf %136, %137 : vector<8x32xf32>
    %139 = arith.index_cast %c2_i32 : i32 to index
    %c0_82 = arith.constant 0 : index
    %c0_83 = arith.constant 0 : index
    %140 = vector.load %arg11[%139, %c0_82, %c0_83] : memref<8x8x32xf32, #tpu.memory_space<vmem>>, vector<1x8x32xf32>
    %141 = vector.shape_cast %140 : vector<1x8x32xf32> to vector<8x32xf32>
    %cst_84 = arith.constant dense<0.000000e+00> : vector<8x32xf32>
    %142 = tpu.matmul %128, %43, %cst_84 {dimension_numbers = #tpu.dot_dimension_numbers<[1], [0], [0], [1], [0, 0, 1, 1], [], []>} : vector<8x32xbf16>, vector<32x32xbf16>, vector<8x32xf32> -> vector<8x32xf32>
    %143 = arith.addf %141, %142 : vector<8x32xf32>
    %144 = arith.negf %143 : vector<8x32xf32>
    %145 = math.exp %144 : vector<8x32xf32>
    %cst_85 = arith.constant 1.000000e+00 : f32
    %146 = vector.broadcast %cst_85 : f32 to vector<8x32xf32>
    %147 = arith.addf %146, %145 : vector<8x32xf32>
    %148 = arith.divf %146, %147 : vector<8x32xf32>
    %149 = arith.index_cast %c2_i32 : i32 to index
    %c0_86 = arith.constant 0 : index
    %c0_87 = arith.constant 0 : index
    %150 = vector.load %arg12[%149, %c0_86, %c0_87] : memref<8x8x32xf32, #tpu.memory_space<vmem>>, vector<1x8x32xf32>
    %151 = vector.shape_cast %150 : vector<1x8x32xf32> to vector<8x32xf32>
    %cst_88 = arith.constant dense<0.000000e+00> : vector<8x32xf32>
    %152 = tpu.matmul %128, %45, %cst_88 {dimension_numbers = #tpu.dot_dimension_numbers<[1], [0], [0], [1], [0, 0, 1, 1], [], []>} : vector<8x32xbf16>, vector<32x32xbf16>, vector<8x32xf32> -> vector<8x32xf32>
    %153 = arith.addf %151, %152 : vector<8x32xf32>
    %154 = math.tanh %153 : vector<8x32xf32>
    %155 = arith.mulf %138, %117 : vector<8x32xf32>
    %156 = arith.mulf %10, %154 : vector<8x32xf32>
    %157 = arith.addf %155, %156 : vector<8x32xf32>
    %158 = math.tanh %157 : vector<8x32xf32>
    %159 = arith.mulf %148, %158 : vector<8x32xf32>
    %160 = arith.index_cast %c2_i32 : i32 to index
    %c0_89 = arith.constant 0 : index
    %c0_90 = arith.constant 0 : index
    %161 = vector.load %arg8[%160, %c0_89, %c0_90] : memref<8x8x32xf32, #tpu.memory_space<vmem>>, vector<1x8x32xf32>
    %162 = vector.shape_cast %161 : vector<1x8x32xf32> to vector<8x32xf32>
    %163 = vector.shape_cast %159 : vector<8x32xf32> to vector<1x8x32xf32>
    tpu.vector_store %arg8[%160, %c0_89, %c0_90], %163 {strides = array<i32>} : memref<8x8x32xf32, #tpu.memory_space<vmem>>, vector<1x8x32xf32>,
    %164 = arith.index_cast %c2_i32 : i32 to index
    %c0_91 = arith.constant 0 : index
    %c0_92 = arith.constant 0 : index
    %165 = vector.load %arg9[%164, %c0_91, %c0_92] : memref<8x8x32xf32, #tpu.memory_space<vmem>>, vector<1x8x32xf32>
    %166 = vector.shape_cast %165 : vector<1x8x32xf32> to vector<8x32xf32>
    %167 = vector.shape_cast %157 : vector<8x32xf32> to vector<1x8x32xf32>
    tpu.vector_store %arg9[%164, %c0_91, %c0_92], %167 {strides = array<i32>} : memref<8x8x32xf32, #tpu.memory_space<vmem>>, vector<1x8x32xf32>,
    %c3_i32 = arith.constant 3 : i32
    %168 = arith.truncf %159 : vector<8x32xf32> to vector<8x32xbf16>
    %169 = arith.index_cast %c3_i32 : i32 to index
    %c0_93 = arith.constant 0 : index
    %c0_94 = arith.constant 0 : index
    %170 = vector.load %arg10[%169, %c0_93, %c0_94] : memref<8x8x32xf32, #tpu.memory_space<vmem>>, vector<1x8x32xf32>
    %171 = vector.shape_cast %170 : vector<1x8x32xf32> to vector<8x32xf32>
    %cst_95 = arith.constant dense<0.000000e+00> : vector<8x32xf32>
    %172 = tpu.matmul %168, %41, %cst_95 {dimension_numbers = #tpu.dot_dimension_numbers<[1], [0], [0], [1], [0, 0, 1, 1], [], []>} : vector<8x32xbf16>, vector<32x32xbf16>, vector<8x32xf32> -> vector<8x32xf32>
    %173 = arith.addf %171, %172 : vector<8x32xf32>
    %174 = arith.negf %173 : vector<8x32xf32>
    %175 = math.exp %174 : vector<8x32xf32>
    %cst_96 = arith.constant 1.000000e+00 : f32
    %176 = vector.broadcast %cst_96 : f32 to vector<8x32xf32>
    %177 = arith.addf %176, %175 : vector<8x32xf32>
    %178 = arith.divf %176, %177 : vector<8x32xf32>
    %179 = arith.index_cast %c3_i32 : i32 to index
    %c0_97 = arith.constant 0 : index
    %c0_98 = arith.constant 0 : index
    %180 = vector.load %arg11[%179, %c0_97, %c0_98] : memref<8x8x32xf32, #tpu.memory_space<vmem>>, vector<1x8x32xf32>
    %181 = vector.shape_cast %180 : vector<1x8x32xf32> to vector<8x32xf32>
    %cst_99 = arith.constant dense<0.000000e+00> : vector<8x32xf32>
    %182 = tpu.matmul %168, %43, %cst_99 {dimension_numbers = #tpu.dot_dimension_numbers<[1], [0], [0], [1], [0, 0, 1, 1], [], []>} : vector<8x32xbf16>, vector<32x32xbf16>, vector<8x32xf32> -> vector<8x32xf32>
    %183 = arith.addf %181, %182 : vector<8x32xf32>
    %184 = arith.negf %183 : vector<8x32xf32>
    %185 = math.exp %184 : vector<8x32xf32>
    %cst_100 = arith.constant 1.000000e+00 : f32
    %186 = vector.broadcast %cst_100 : f32 to vector<8x32xf32>
    %187 = arith.addf %186, %185 : vector<8x32xf32>
    %188 = arith.divf %186, %187 : vector<8x32xf32>
    %189 = arith.index_cast %c3_i32 : i32 to index
    %c0_101 = arith.constant 0 : index
    %c0_102 = arith.constant 0 : index
    %190 = vector.load %arg12[%189, %c0_101, %c0_102] : memref<8x8x32xf32, #tpu.memory_space<vmem>>, vector<1x8x32xf32>
    %191 = vector.shape_cast %190 : vector<1x8x32xf32> to vector<8x32xf32>
    %cst_103 = arith.constant dense<0.000000e+00> : vector<8x32xf32>
    %192 = tpu.matmul %168, %45, %cst_103 {dimension_numbers = #tpu.dot_dimension_numbers<[1], [0], [0], [1], [0, 0, 1, 1], [], []>} : vector<8x32xbf16>, vector<32x32xbf16>, vector<8x32xf32> -> vector<8x32xf32>
    %193 = arith.addf %191, %192 : vector<8x32xf32>
    %194 = math.tanh %193 : vector<8x32xf32>
    %195 = arith.mulf %178, %157 : vector<8x32xf32>
    %196 = arith.mulf %10, %194 : vector<8x32xf32>
    %197 = arith.addf %195, %196 : vector<8x32xf32>
    %198 = math.tanh %197 : vector<8x32xf32>
    %199 = arith.mulf %188, %198 : vector<8x32xf32>
    %200 = arith.index_cast %c3_i32 : i32 to index
    %c0_104 = arith.constant 0 : index
    %c0_105 = arith.constant 0 : index
    %201 = vector.load %arg8[%200, %c0_104, %c0_105] : memref<8x8x32xf32, #tpu.memory_space<vmem>>, vector<1x8x32xf32>
    %202 = vector.shape_cast %201 : vector<1x8x32xf32> to vector<8x32xf32>
    %203 = vector.shape_cast %199 : vector<8x32xf32> to vector<1x8x32xf32>
    tpu.vector_store %arg8[%200, %c0_104, %c0_105], %203 {strides = array<i32>} : memref<8x8x32xf32, #tpu.memory_space<vmem>>, vector<1x8x32xf32>,
    %204 = arith.index_cast %c3_i32 : i32 to index
    %c0_106 = arith.constant 0 : index
    %c0_107 = arith.constant 0 : index
    %205 = vector.load %arg9[%204, %c0_106, %c0_107] : memref<8x8x32xf32, #tpu.memory_space<vmem>>, vector<1x8x32xf32>
    %206 = vector.shape_cast %205 : vector<1x8x32xf32> to vector<8x32xf32>
    %207 = vector.shape_cast %197 : vector<8x32xf32> to vector<1x8x32xf32>
    tpu.vector_store %arg9[%204, %c0_106, %c0_107], %207 {strides = array<i32>} : memref<8x8x32xf32, #tpu.memory_space<vmem>>, vector<1x8x32xf32>,
    %c4_i32 = arith.constant 4 : i32
    %208 = arith.truncf %199 : vector<8x32xf32> to vector<8x32xbf16>
    %209 = arith.index_cast %c4_i32 : i32 to index
    %c0_108 = arith.constant 0 : index
    %c0_109 = arith.constant 0 : index
    %210 = vector.load %arg10[%209, %c0_108, %c0_109] : memref<8x8x32xf32, #tpu.memory_space<vmem>>, vector<1x8x32xf32>
    %211 = vector.shape_cast %210 : vector<1x8x32xf32> to vector<8x32xf32>
    %cst_110 = arith.constant dense<0.000000e+00> : vector<8x32xf32>
    %212 = tpu.matmul %208, %41, %cst_110 {dimension_numbers = #tpu.dot_dimension_numbers<[1], [0], [0], [1], [0, 0, 1, 1], [], []>} : vector<8x32xbf16>, vector<32x32xbf16>, vector<8x32xf32> -> vector<8x32xf32>
    %213 = arith.addf %211, %212 : vector<8x32xf32>
    %214 = arith.negf %213 : vector<8x32xf32>
    %215 = math.exp %214 : vector<8x32xf32>
    %cst_111 = arith.constant 1.000000e+00 : f32
    %216 = vector.broadcast %cst_111 : f32 to vector<8x32xf32>
    %217 = arith.addf %216, %215 : vector<8x32xf32>
    %218 = arith.divf %216, %217 : vector<8x32xf32>
    %219 = arith.index_cast %c4_i32 : i32 to index
    %c0_112 = arith.constant 0 : index
    %c0_113 = arith.constant 0 : index
    %220 = vector.load %arg11[%219, %c0_112, %c0_113] : memref<8x8x32xf32, #tpu.memory_space<vmem>>, vector<1x8x32xf32>
    %221 = vector.shape_cast %220 : vector<1x8x32xf32> to vector<8x32xf32>
    %cst_114 = arith.constant dense<0.000000e+00> : vector<8x32xf32>
    %222 = tpu.matmul %208, %43, %cst_114 {dimension_numbers = #tpu.dot_dimension_numbers<[1], [0], [0], [1], [0, 0, 1, 1], [], []>} : vector<8x32xbf16>, vector<32x32xbf16>, vector<8x32xf32> -> vector<8x32xf32>
    %223 = arith.addf %221, %222 : vector<8x32xf32>
    %224 = arith.negf %223 : vector<8x32xf32>
    %225 = math.exp %224 : vector<8x32xf32>
    %cst_115 = arith.constant 1.000000e+00 : f32
    %226 = vector.broadcast %cst_115 : f32 to vector<8x32xf32>
    %227 = arith.addf %226, %225 : vector<8x32xf32>
    %228 = arith.divf %226, %227 : vector<8x32xf32>
    %229 = arith.index_cast %c4_i32 : i32 to index
    %c0_116 = arith.constant 0 : index
    %c0_117 = arith.constant 0 : index
    %230 = vector.load %arg12[%229, %c0_116, %c0_117] : memref<8x8x32xf32, #tpu.memory_space<vmem>>, vector<1x8x32xf32>
    %231 = vector.shape_cast %230 : vector<1x8x32xf32> to vector<8x32xf32>
    %cst_118 = arith.constant dense<0.000000e+00> : vector<8x32xf32>
    %232 = tpu.matmul %208, %45, %cst_118 {dimension_numbers = #tpu.dot_dimension_numbers<[1], [0], [0], [1], [0, 0, 1, 1], [], []>} : vector<8x32xbf16>, vector<32x32xbf16>, vector<8x32xf32> -> vector<8x32xf32>
    %233 = arith.addf %231, %232 : vector<8x32xf32>
    %234 = math.tanh %233 : vector<8x32xf32>
    %235 = arith.mulf %218, %197 : vector<8x32xf32>
    %236 = arith.mulf %10, %234 : vector<8x32xf32>
    %237 = arith.addf %235, %236 : vector<8x32xf32>
    %238 = math.tanh %237 : vector<8x32xf32>
    %239 = arith.mulf %228, %238 : vector<8x32xf32>
    %240 = arith.index_cast %c4_i32 : i32 to index
    %c0_119 = arith.constant 0 : index
    %c0_120 = arith.constant 0 : index
    %241 = vector.load %arg8[%240, %c0_119, %c0_120] : memref<8x8x32xf32, #tpu.memory_space<vmem>>, vector<1x8x32xf32>
    %242 = vector.shape_cast %241 : vector<1x8x32xf32> to vector<8x32xf32>
    %243 = vector.shape_cast %239 : vector<8x32xf32> to vector<1x8x32xf32>
    tpu.vector_store %arg8[%240, %c0_119, %c0_120], %243 {strides = array<i32>} : memref<8x8x32xf32, #tpu.memory_space<vmem>>, vector<1x8x32xf32>,
    %244 = arith.index_cast %c4_i32 : i32 to index
    %c0_121 = arith.constant 0 : index
    %c0_122 = arith.constant 0 : index
    %245 = vector.load %arg9[%244, %c0_121, %c0_122] : memref<8x8x32xf32, #tpu.memory_space<vmem>>, vector<1x8x32xf32>
    %246 = vector.shape_cast %245 : vector<1x8x32xf32> to vector<8x32xf32>
    %247 = vector.shape_cast %237 : vector<8x32xf32> to vector<1x8x32xf32>
    tpu.vector_store %arg9[%244, %c0_121, %c0_122], %247 {strides = array<i32>} : memref<8x8x32xf32, #tpu.memory_space<vmem>>, vector<1x8x32xf32>,
    %c5_i32 = arith.constant 5 : i32
    %248 = arith.truncf %239 : vector<8x32xf32> to vector<8x32xbf16>
    %249 = arith.index_cast %c5_i32 : i32 to index
    %c0_123 = arith.constant 0 : index
    %c0_124 = arith.constant 0 : index
    %250 = vector.load %arg10[%249, %c0_123, %c0_124] : memref<8x8x32xf32, #tpu.memory_space<vmem>>, vector<1x8x32xf32>
    %251 = vector.shape_cast %250 : vector<1x8x32xf32> to vector<8x32xf32>
    %cst_125 = arith.constant dense<0.000000e+00> : vector<8x32xf32>
    %252 = tpu.matmul %248, %41, %cst_125 {dimension_numbers = #tpu.dot_dimension_numbers<[1], [0], [0], [1], [0, 0, 1, 1], [], []>} : vector<8x32xbf16>, vector<32x32xbf16>, vector<8x32xf32> -> vector<8x32xf32>
    %253 = arith.addf %251, %252 : vector<8x32xf32>
    %254 = arith.negf %253 : vector<8x32xf32>
    %255 = math.exp %254 : vector<8x32xf32>
    %cst_126 = arith.constant 1.000000e+00 : f32
    %256 = vector.broadcast %cst_126 : f32 to vector<8x32xf32>
    %257 = arith.addf %256, %255 : vector<8x32xf32>
    %258 = arith.divf %256, %257 : vector<8x32xf32>
    %259 = arith.index_cast %c5_i32 : i32 to index
    %c0_127 = arith.constant 0 : index
    %c0_128 = arith.constant 0 : index
    %260 = vector.load %arg11[%259, %c0_127, %c0_128] : memref<8x8x32xf32, #tpu.memory_space<vmem>>, vector<1x8x32xf32>
    %261 = vector.shape_cast %260 : vector<1x8x32xf32> to vector<8x32xf32>
    %cst_129 = arith.constant dense<0.000000e+00> : vector<8x32xf32>
    %262 = tpu.matmul %248, %43, %cst_129 {dimension_numbers = #tpu.dot_dimension_numbers<[1], [0], [0], [1], [0, 0, 1, 1], [], []>} : vector<8x32xbf16>, vector<32x32xbf16>, vector<8x32xf32> -> vector<8x32xf32>
    %263 = arith.addf %261, %262 : vector<8x32xf32>
    %264 = arith.negf %263 : vector<8x32xf32>
    %265 = math.exp %264 : vector<8x32xf32>
    %cst_130 = arith.constant 1.000000e+00 : f32
    %266 = vector.broadcast %cst_130 : f32 to vector<8x32xf32>
    %267 = arith.addf %266, %265 : vector<8x32xf32>
    %268 = arith.divf %266, %267 : vector<8x32xf32>
    %269 = arith.index_cast %c5_i32 : i32 to index
    %c0_131 = arith.constant 0 : index
    %c0_132 = arith.constant 0 : index
    %270 = vector.load %arg12[%269, %c0_131, %c0_132] : memref<8x8x32xf32, #tpu.memory_space<vmem>>, vector<1x8x32xf32>
    %271 = vector.shape_cast %270 : vector<1x8x32xf32> to vector<8x32xf32>
    %cst_133 = arith.constant dense<0.000000e+00> : vector<8x32xf32>
    %272 = tpu.matmul %248, %45, %cst_133 {dimension_numbers = #tpu.dot_dimension_numbers<[1], [0], [0], [1], [0, 0, 1, 1], [], []>} : vector<8x32xbf16>, vector<32x32xbf16>, vector<8x32xf32> -> vector<8x32xf32>
    %273 = arith.addf %271, %272 : vector<8x32xf32>
    %274 = math.tanh %273 : vector<8x32xf32>
    %275 = arith.mulf %258, %237 : vector<8x32xf32>
    %276 = arith.mulf %10, %274 : vector<8x32xf32>
    %277 = arith.addf %275, %276 : vector<8x32xf32>
    %278 = math.tanh %277 : vector<8x32xf32>
    %279 = arith.mulf %268, %278 : vector<8x32xf32>
    %280 = arith.index_cast %c5_i32 : i32 to index
    %c0_134 = arith.constant 0 : index
    %c0_135 = arith.constant 0 : index
    %281 = vector.load %arg8[%280, %c0_134, %c0_135] : memref<8x8x32xf32, #tpu.memory_space<vmem>>, vector<1x8x32xf32>
    %282 = vector.shape_cast %281 : vector<1x8x32xf32> to vector<8x32xf32>
    %283 = vector.shape_cast %279 : vector<8x32xf32> to vector<1x8x32xf32>
    tpu.vector_store %arg8[%280, %c0_134, %c0_135], %283 {strides = array<i32>} : memref<8x8x32xf32, #tpu.memory_space<vmem>>, vector<1x8x32xf32>,
    %284 = arith.index_cast %c5_i32 : i32 to index
    %c0_136 = arith.constant 0 : index
    %c0_137 = arith.constant 0 : index
    %285 = vector.load %arg9[%284, %c0_136, %c0_137] : memref<8x8x32xf32, #tpu.memory_space<vmem>>, vector<1x8x32xf32>
    %286 = vector.shape_cast %285 : vector<1x8x32xf32> to vector<8x32xf32>
    %287 = vector.shape_cast %277 : vector<8x32xf32> to vector<1x8x32xf32>
    tpu.vector_store %arg9[%284, %c0_136, %c0_137], %287 {strides = array<i32>} : memref<8x8x32xf32, #tpu.memory_space<vmem>>, vector<1x8x32xf32>,
    %c6_i32 = arith.constant 6 : i32
    %288 = arith.truncf %279 : vector<8x32xf32> to vector<8x32xbf16>
    %289 = arith.index_cast %c6_i32 : i32 to index
    %c0_138 = arith.constant 0 : index
    %c0_139 = arith.constant 0 : index
    %290 = vector.load %arg10[%289, %c0_138, %c0_139] : memref<8x8x32xf32, #tpu.memory_space<vmem>>, vector<1x8x32xf32>
    %291 = vector.shape_cast %290 : vector<1x8x32xf32> to vector<8x32xf32>
    %cst_140 = arith.constant dense<0.000000e+00> : vector<8x32xf32>
    %292 = tpu.matmul %288, %41, %cst_140 {dimension_numbers = #tpu.dot_dimension_numbers<[1], [0], [0], [1], [0, 0, 1, 1], [], []>} : vector<8x32xbf16>, vector<32x32xbf16>, vector<8x32xf32> -> vector<8x32xf32>
    %293 = arith.addf %291, %292 : vector<8x32xf32>
    %294 = arith.negf %293 : vector<8x32xf32>
    %295 = math.exp %294 : vector<8x32xf32>
    %cst_141 = arith.constant 1.000000e+00 : f32
    %296 = vector.broadcast %cst_141 : f32 to vector<8x32xf32>
    %297 = arith.addf %296, %295 : vector<8x32xf32>
    %298 = arith.divf %296, %297 : vector<8x32xf32>
    %299 = arith.index_cast %c6_i32 : i32 to index
    %c0_142 = arith.constant 0 : index
    %c0_143 = arith.constant 0 : index
    %300 = vector.load %arg11[%299, %c0_142, %c0_143] : memref<8x8x32xf32, #tpu.memory_space<vmem>>, vector<1x8x32xf32>
    %301 = vector.shape_cast %300 : vector<1x8x32xf32> to vector<8x32xf32>
    %cst_144 = arith.constant dense<0.000000e+00> : vector<8x32xf32>
    %302 = tpu.matmul %288, %43, %cst_144 {dimension_numbers = #tpu.dot_dimension_numbers<[1], [0], [0], [1], [0, 0, 1, 1], [], []>} : vector<8x32xbf16>, vector<32x32xbf16>, vector<8x32xf32> -> vector<8x32xf32>
    %303 = arith.addf %301, %302 : vector<8x32xf32>
    %304 = arith.negf %303 : vector<8x32xf32>
    %305 = math.exp %304 : vector<8x32xf32>
    %cst_145 = arith.constant 1.000000e+00 : f32
    %306 = vector.broadcast %cst_145 : f32 to vector<8x32xf32>
    %307 = arith.addf %306, %305 : vector<8x32xf32>
    %308 = arith.divf %306, %307 : vector<8x32xf32>
    %309 = arith.index_cast %c6_i32 : i32 to index
    %c0_146 = arith.constant 0 : index
    %c0_147 = arith.constant 0 : index
    %310 = vector.load %arg12[%309, %c0_146, %c0_147] : memref<8x8x32xf32, #tpu.memory_space<vmem>>, vector<1x8x32xf32>
    %311 = vector.shape_cast %310 : vector<1x8x32xf32> to vector<8x32xf32>
    %cst_148 = arith.constant dense<0.000000e+00> : vector<8x32xf32>
    %312 = tpu.matmul %288, %45, %cst_148 {dimension_numbers = #tpu.dot_dimension_numbers<[1], [0], [0], [1], [0, 0, 1, 1], [], []>} : vector<8x32xbf16>, vector<32x32xbf16>, vector<8x32xf32> -> vector<8x32xf32>
    %313 = arith.addf %311, %312 : vector<8x32xf32>
    %314 = math.tanh %313 : vector<8x32xf32>
    %315 = arith.mulf %298, %277 : vector<8x32xf32>
    %316 = arith.mulf %10, %314 : vector<8x32xf32>
    %317 = arith.addf %315, %316 : vector<8x32xf32>
    %318 = math.tanh %317 : vector<8x32xf32>
    %319 = arith.mulf %308, %318 : vector<8x32xf32>
    %320 = arith.index_cast %c6_i32 : i32 to index
    %c0_149 = arith.constant 0 : index
    %c0_150 = arith.constant 0 : index
    %321 = vector.load %arg8[%320, %c0_149, %c0_150] : memref<8x8x32xf32, #tpu.memory_space<vmem>>, vector<1x8x32xf32>
    %322 = vector.shape_cast %321 : vector<1x8x32xf32> to vector<8x32xf32>
    %323 = vector.shape_cast %319 : vector<8x32xf32> to vector<1x8x32xf32>
    tpu.vector_store %arg8[%320, %c0_149, %c0_150], %323 {strides = array<i32>} : memref<8x8x32xf32, #tpu.memory_space<vmem>>, vector<1x8x32xf32>,
    %324 = arith.index_cast %c6_i32 : i32 to index
    %c0_151 = arith.constant 0 : index
    %c0_152 = arith.constant 0 : index
    %325 = vector.load %arg9[%324, %c0_151, %c0_152] : memref<8x8x32xf32, #tpu.memory_space<vmem>>, vector<1x8x32xf32>
    %326 = vector.shape_cast %325 : vector<1x8x32xf32> to vector<8x32xf32>
    %327 = vector.shape_cast %317 : vector<8x32xf32> to vector<1x8x32xf32>
    tpu.vector_store %arg9[%324, %c0_151, %c0_152], %327 {strides = array<i32>} : memref<8x8x32xf32, #tpu.memory_space<vmem>>, vector<1x8x32xf32>,
    %c7_i32 = arith.constant 7 : i32
    %328 = arith.truncf %319 : vector<8x32xf32> to vector<8x32xbf16>
    %329 = arith.index_cast %c7_i32 : i32 to index
    %c0_153 = arith.constant 0 : index
    %c0_154 = arith.constant 0 : index
    %330 = vector.load %arg10[%329, %c0_153, %c0_154] : memref<8x8x32xf32, #tpu.memory_space<vmem>>, vector<1x8x32xf32>
    %331 = vector.shape_cast %330 : vector<1x8x32xf32> to vector<8x32xf32>
    %cst_155 = arith.constant dense<0.000000e+00> : vector<8x32xf32>
    %332 = tpu.matmul %328, %41, %cst_155 {dimension_numbers = #tpu.dot_dimension_numbers<[1], [0], [0], [1], [0, 0, 1, 1], [], []>} : vector<8x32xbf16>, vector<32x32xbf16>, vector<8x32xf32> -> vector<8x32xf32>
    %333 = arith.addf %331, %332 : vector<8x32xf32>
    %334 = arith.negf %333 : vector<8x32xf32>
    %335 = math.exp %334 : vector<8x32xf32>
    %cst_156 = arith.constant 1.000000e+00 : f32
    %336 = vector.broadcast %cst_156 : f32 to vector<8x32xf32>
    %337 = arith.addf %336, %335 : vector<8x32xf32>
    %338 = arith.divf %336, %337 : vector<8x32xf32>
    %339 = arith.index_cast %c7_i32 : i32 to index
    %c0_157 = arith.constant 0 : index
    %c0_158 = arith.constant 0 : index
    %340 = vector.load %arg11[%339, %c0_157, %c0_158] : memref<8x8x32xf32, #tpu.memory_space<vmem>>, vector<1x8x32xf32>
    %341 = vector.shape_cast %340 : vector<1x8x32xf32> to vector<8x32xf32>
    %cst_159 = arith.constant dense<0.000000e+00> : vector<8x32xf32>
    %342 = tpu.matmul %328, %43, %cst_159 {dimension_numbers = #tpu.dot_dimension_numbers<[1], [0], [0], [1], [0, 0, 1, 1], [], []>} : vector<8x32xbf16>, vector<32x32xbf16>, vector<8x32xf32> -> vector<8x32xf32>
    %343 = arith.addf %341, %342 : vector<8x32xf32>
    %344 = arith.negf %343 : vector<8x32xf32>
    %345 = math.exp %344 : vector<8x32xf32>
    %cst_160 = arith.constant 1.000000e+00 : f32
    %346 = vector.broadcast %cst_160 : f32 to vector<8x32xf32>
    %347 = arith.addf %346, %345 : vector<8x32xf32>
    %348 = arith.divf %346, %347 : vector<8x32xf32>
    %349 = arith.index_cast %c7_i32 : i32 to index
    %c0_161 = arith.constant 0 : index
    %c0_162 = arith.constant 0 : index
    %350 = vector.load %arg12[%349, %c0_161, %c0_162] : memref<8x8x32xf32, #tpu.memory_space<vmem>>, vector<1x8x32xf32>
    %351 = vector.shape_cast %350 : vector<1x8x32xf32> to vector<8x32xf32>
    %cst_163 = arith.constant dense<0.000000e+00> : vector<8x32xf32>
    %352 = tpu.matmul %328, %45, %cst_163 {dimension_numbers = #tpu.dot_dimension_numbers<[1], [0], [0], [1], [0, 0, 1, 1], [], []>} : vector<8x32xbf16>, vector<32x32xbf16>, vector<8x32xf32> -> vector<8x32xf32>
    %353 = arith.addf %351, %352 : vector<8x32xf32>
    %354 = math.tanh %353 : vector<8x32xf32>
    %355 = arith.mulf %338, %317 : vector<8x32xf32>
    %356 = arith.mulf %10, %354 : vector<8x32xf32>
    %357 = arith.addf %355, %356 : vector<8x32xf32>
    %358 = math.tanh %357 : vector<8x32xf32>
    %359 = arith.mulf %348, %358 : vector<8x32xf32>
    %360 = arith.index_cast %c7_i32 : i32 to index
    %c0_164 = arith.constant 0 : index
    %c0_165 = arith.constant 0 : index
    %361 = vector.load %arg8[%360, %c0_164, %c0_165] : memref<8x8x32xf32, #tpu.memory_space<vmem>>, vector<1x8x32xf32>
    %362 = vector.shape_cast %361 : vector<1x8x32xf32> to vector<8x32xf32>
    %363 = vector.shape_cast %359 : vector<8x32xf32> to vector<1x8x32xf32>
    tpu.vector_store %arg8[%360, %c0_164, %c0_165], %363 {strides = array<i32>} : memref<8x8x32xf32, #tpu.memory_space<vmem>>, vector<1x8x32xf32>,
    %364 = arith.index_cast %c7_i32 : i32 to index
    %c0_166 = arith.constant 0 : index
    %c0_167 = arith.constant 0 : index
    %365 = vector.load %arg9[%364, %c0_166, %c0_167] : memref<8x8x32xf32, #tpu.memory_space<vmem>>, vector<1x8x32xf32>
    %366 = vector.shape_cast %365 : vector<1x8x32xf32> to vector<8x32xf32>
    %367 = vector.shape_cast %357 : vector<8x32xf32> to vector<1x8x32xf32>
    tpu.vector_store %arg9[%364, %c0_166, %c0_167], %367 {strides = array<i32>} : memref<8x8x32xf32, #tpu.memory_space<vmem>>, vector<1x8x32xf32>,
    %c8_i32 = arith.constant 8 : i32
    return
  }
  func.func @transform_0(%arg0: i32) -> (i32, i32, i32) {
    %c0_i32 = arith.constant 0 : i32
    %c0_i32_0 = arith.constant 0 : i32
    %c0_i32_1 = arith.constant 0 : i32
    return %c0_i32, %arg0, %c0_i32_0 : i32, i32, i32
  }
  func.func @transform_1(%arg0: i32) -> (i32, i32) {
    %c0_i32 = arith.constant 0 : i32
    %c0_i32_0 = arith.constant 0 : i32
    return %arg0, %c0_i32 : i32, i32
  }
  func.func @transform_2(%arg0: i32) -> (i32, i32, i32) {
    %c0_i32 = arith.constant 0 : i32
    %c0_i32_0 = arith.constant 0 : i32
    %c0_i32_1 = arith.constant 0 : i32
    %c0_i32_2 = arith.constant 0 : i32
    return %c0_i32, %c0_i32_0, %c0_i32_1 : i32, i32, i32
  }
  func.func @transform_3(%arg0: i32) -> (i32, i32, i32) {
    %c0_i32 = arith.constant 0 : i32
    %c0_i32_0 = arith.constant 0 : i32
    %c0_i32_1 = arith.constant 0 : i32
    %c0_i32_2 = arith.constant 0 : i32
    return %c0_i32, %c0_i32_0, %c0_i32_1 : i32, i32, i32
  }
  func.func @transform_4(%arg0: i32) -> (i32, i32) {
    %c0_i32 = arith.constant 0 : i32
    %c0_i32_0 = arith.constant 0 : i32
    %c0_i32_1 = arith.constant 0 : i32
    return %c0_i32, %c0_i32_0 : i32, i32
  }
  func.func @transform_5(%arg0: i32) -> (i32, i32, i32) {
    %c0_i32 = arith.constant 0 : i32
    %c0_i32_0 = arith.constant 0 : i32
    %c0_i32_1 = arith.constant 0 : i32
    %c0_i32_2 = arith.constant 0 : i32
    return %c0_i32, %c0_i32_0, %c0_i32_1 : i32, i32, i32
  }
  func.func @transform_6(%arg0: i32) -> (i32, i32) {
    %c0_i32 = arith.constant 0 : i32
    %c0_i32_0 = arith.constant 0 : i32
    %c0_i32_1 = arith.constant 0 : i32
    return %c0_i32, %c0_i32_0 : i32, i32
  }
  func.func @transform_7(%arg0: i32) -> (i32, i32, i32) {
    %c0_i32 = arith.constant 0 : i32
    %c0_i32_0 = arith.constant 0 : i32
    %c0_i32_1 = arith.constant 0 : i32
    return %c0_i32, %arg0, %c0_i32_0 : i32, i32, i32
  }
  func.func @transform_8(%arg0: i32) -> (i32, i32, i32) {
    %c0_i32 = arith.constant 0 : i32
    %c0_i32_0 = arith.constant 0 : i32
    %c0_i32_1 = arith.constant 0 : i32
    return %c0_i32, %arg0, %c0_i32_0 : i32, i32, i32
  }
}

</mosaic_0001>

<bundles_post_ra>
// kernel: tpu_custom_call.1
= control target key start
LH: loop header
LB: loop body
LE: loop exit
PB: predicated region body
PF: predicated region fallthrough
CT: control target
= control target key end

     0   :  { %14 = vsyncpa [#allocation6], 0  ;;  %vm41_vm0 = vcmask 1043456   ;;  %vm122_vm1 = vcmask 1044480   ;;  %vm37_vm2 = vcmask 31744   ;;  %vm97_vm3 = vcmask 39936   ;;  %s1792_s0 = inlined_call_operand.vmem [shape: f32[8,8,5], index: 0, kind: input, shape index: {}]   ;;  %s1793_s1 = inlined_call_operand.vmem [shape: f32[8,4], index: 1, kind: input, shape index: {}]   ;;  %s1794_s2 = inlined_call_operand.vmem [shape: f32[3,5,32], index: 2, kind: input, shape index: {}]   ;;  %s1795_s3 = inlined_call_operand.vmem [shape: bf16[3,32,32], index: 3, kind: input, shape index: {}]   ;;  %s1796_s4 = inlined_call_operand.vmem [shape: f32[4,32], index: 4, kind: input, shape index: {}]   ;;  %s1797_s5 = inlined_call_operand.vmem [shape: f32[3,1,32], index: 5, kind: input, shape index: {}]   ;;  %s1798_s6 = inlined_call_operand.vmem [shape: f32[1,32], index: 6, kind: input, shape index: {}]   ;;  %s1799_s7 = inlined_call_operand.hbm [shape: f32[8,8,32], index: 7, kind: output, shape index: {0}]   ;;  %s1800_s8 = inlined_call_operand.hbm [shape: f32[8,8,32], index: 8, kind: output, shape index: {1}]  }
   0x1   :  { %v32_v0 = vld [vmem:[%s1796_s4] sm:$0xf]  ;;  %v1510_v4 = vld [vmem:[%s1795_s3 + $0x8] sm:$0xff]  ;;  %v1526_v7 = vld [vmem:[%s1795_s3 + $0x18] sm:$0xff] }
   0x2   :  { %v92_v1 = vld [vmem:[%s1794_s2] sm:$0x1f]  ;;  %1174 = vmatpush.msk.msra.mxu0 %vm41_vm0, %v32_v0  ;;  %v1186_v5 = vld [vmem:[%s1794_s2 + $0x8] sm:$0x1f]  ;;  %v1197_v8 = vld [vmem:[%s1794_s2 + $0x10] sm:$0x1f] }
   0x3   :  { %1177 = vmatpush.msk.msra.mxu1 %vm122_vm1, %v92_v1  ;;  %v31_v2 = vld [vmem:[%s1793_s1] sm:$0xff]  ;;  %1188 = vmatpush.msk.msra.mxu2 %vm122_vm1, %v1186_v5  ;;  %v1536_v9 = vld [vmem:[%s1795_s3 + $0x28] sm:$0xff] }
   0x4   :  { %v84_v3 = vld [vmem:[%s1792_s0] sm:$0xff]  ;;  %1175 = vmatmul.msk.f32.vlgmr.msra.gmra.mxu0 %vm37_vm2, %v31_v2  ;;  %1199 = vmatpush.msk.msra.mxu3 %vm122_vm1, %v1197_v8 }
   0x5   :  { %1178 = vmatmul.msk.f32.vlgmr.msra.gmra.mxu1 %vm97_vm3, %v84_v3  ;;  %330 = vmatpush.bf16.msrb.mxu0 %v1510_v4  ;;  %v1520_v6 = vld [vmem:[%s1795_s3] sm:$0xff] }
   0x6   :  { %1189 = vmatmul.msk.f32.vlgmr.msra.gmra.mxu2 %vm97_vm3, %v84_v3  ;;  %1200 = vmatmul.msk.f32.vlgmr.msra.gmra.mxu3 %vm97_vm3, %v84_v3 }
   0x7   :  { %485 = vmatpush.bf16.msrb.mxu1 %v1526_v7 }
   0x8   :  { %15 = vsyncpa [#allocation8], 0  ;;  %520 = vmatpush.bf16.msrb.mxu2 %v1536_v9  ;;  %550 = vmatpush.bf16.msrb.mxu3 %v1510_v4  ;;  %v1546_v10 = vld [vmem:[%s1795_s3 + $0x10] sm:$0xff]  ;;  %v1552_v11 = vld [vmem:[%s1795_s3 + $0x20] sm:$0xff]  ;;  %v1444_v12 = vmov 0   ;;  %vm167_vm4 = vcmask 261120  }
   0x9   :  { %331 = vmatpush.bf16.msrb.mxu0 %v1520_v6  ;;  %v85_v13 = vld [vmem:[%s1792_s0 + $0x8] sm:$0xff]  ;;  %v86_v14 = vld [vmem:[%s1792_s0 + $0x10] sm:$0xff]  ;;  %v87_v15 = vld [vmem:[%s1792_s0 + $0x18] sm:$0xff]  ;;  %s1157_s23 = sshll.u32 %s1800_s8, 4  ;;  %s1446_s24 = smov 128   ;;  %s1158_s23 = int_to_ptr.hbm [resolvable:$true] %s1157_s23 }
   0xa   :  { %v1288_v16 = vld [vmem:[%s1798_s6] ss:$0 sm:$0xff]  ;;  %v1607_v24 = vld [vmem:[%s1797_s5 + $0x1] ss:$0 sm:$0xff]  ;;  %v1612_v25 = vld [vmem:[%s1797_s5 + $0x2] ss:$0 sm:$0xff] }
   0xb   :  { %486 = vmatpush.bf16.msrb.mxu1 %v1546_v10  ;;  %v1594_v17 = vld [vmem:[%s1797_s5] ss:$0 sm:$0xff]  ;;  %v89_v28 = vld [vmem:[%s1792_s0 + $0x28] sm:$0xff]  ;;  %v90_v37 = vld [vmem:[%s1792_s0 + $0x30] sm:$0xff]  ;;  %s1447_s25 = smov 8   ;;  %s1448_s8 = smov [#allocation5]  }
   0xc   :  { %332 = vmatmul.bf16.vlgmr.msrb.gmra.mxu0 %v1444_v12  ;;  %521 = vmatpush.bf16.msrb.mxu2 %v1552_v11  ;;  %v88_v20 = vld [vmem:[%s1792_s0 + $0x20] sm:$0xff]  ;;  %v91_v42 = vld [vmem:[%s1792_s0 + $0x38] sm:$0xff]  ;;  %s1445_s0 = smov [#allocation7]   ;;  %s1142_s3 = sshll.u32 %s1448_s8, 4  ;;  %s1143_s3 = int_to_ptr.vmem [resolvable:$true] %s1142_s3 }
   0xd   :  { %376 = vmatpush.bf16.msra.mxu0 %v1526_v7  ;;  %551 = vmatpush.bf16.msrb.mxu3 %v1520_v6  ;;  %s1155_s21 = sshll.u32 %s1445_s0, 4  ;;  %s1144_s28 = sshll.u32 %s1799_s7, 4  ;;  %s1156_s21 = int_to_ptr.vmem [resolvable:$true] %s1155_s21  ;;  %s1145_s28 = int_to_ptr.hbm [resolvable:$true] %s1144_s28 }
   0xe   :  { %1179 = vmatmul.msk.f32.gmra.mxu1 %vm97_vm3, %v85_v13  ;;  %1190 = vmatmul.msk.f32.gmra.mxu2 %vm97_vm3, %v85_v13 }
   0xf   :  { %620 = vmatpush.bf16.msra.mxu1 %v1536_v9  ;;  %1201 = vmatmul.msk.f32.gmra.mxu3 %vm97_vm3, %v85_v13 }
  0x10   :  { %650 = vmatpush.bf16.msra.mxu2 %v1510_v4 }
  0x11   :  { %377 = vmatpush.bf16.msra.mxu0 %v1546_v10  ;;  %685 = vmatpush.bf16.msra.mxu3 %v1526_v7 }
  0x13   :  { %621 = vmatpush.bf16.msra.mxu1 %v1552_v11 }
  0x14   :  { %651 = vmatpush.bf16.msra.mxu2 %v1520_v6 }
  0x15   :  { %422 = vmatpush.bf16.msrb.mxu0 %v1536_v9  ;;  %686 = vmatpush.bf16.msra.mxu3 %v1546_v10 }
  0x16   :  { %1180 = vmatmul.msk.f32.gmra.mxu1 %vm97_vm3, %v86_v14  ;;  %1191 = vmatmul.msk.f32.gmra.mxu2 %vm97_vm3, %v86_v14 }
  0x17   :  { %1202 = vmatmul.msk.f32.gmra.mxu3 %vm97_vm3, %v86_v14 }
  0x19   :  { %423 = vmatpush.bf16.msrb.mxu0 %v1552_v11 }
  0x1c   :  { %378 = vmatmul.bf16.vlgmr.msra.gmra.mxu0 %v1444_v12 }
  0x1d   :  { %450 = vmatpush.bf16.msra.mxu0 %v1510_v4 }
  0x1e   :  { %1181 = vmatmul.msk.f32.gmra.mxu1 %vm97_vm3, %v87_v15  ;;  %1192 = vmatmul.msk.f32.gmra.mxu2 %vm97_vm3, %v87_v15 }
  0x1f   :  { %1203 = vmatmul.msk.f32.gmra.mxu3 %vm97_vm3, %v87_v15 }
  0x21   :  { %451 = vmatpush.bf16.msra.mxu0 %v1520_v6 }
  0x26   :  { %1182 = vmatmul.msk.f32.gmra.mxu1 %vm97_vm3, %v88_v20  ;;  %1193 = vmatmul.msk.f32.gmra.mxu2 %vm97_vm3, %v88_v20 }
  0x27   :  { %1204 = vmatmul.msk.f32.gmra.mxu3 %vm97_vm3, %v88_v20 }
  0x2c   :  { %424 = vmatmul.bf16.vlgmr.msrb.gmra.mxu0 %v1444_v12 }
  0x2d   :  { %585 = vmatpush.bf16.msrb.mxu0 %v1526_v7 }
  0x2e   :  { %1183 = vmatmul.msk.f32.gmra.mxu1 %vm97_vm3, %v89_v28  ;;  %1194 = vmatmul.msk.f32.gmra.mxu2 %vm97_vm3, %v89_v28 }
  0x2f   :  { %1205 = vmatmul.msk.f32.gmra.mxu3 %vm97_vm3, %v89_v28 }
  0x31   :  { %586 = vmatpush.bf16.msrb.mxu0 %v1546_v10 }
  0x36   :  { %1184 = vmatmul.msk.f32.gmra.mxu1 %vm97_vm3, %v90_v37  ;;  %1195 = vmatmul.msk.f32.gmra.mxu2 %vm97_vm3, %v90_v37 }
  0x37   :  { %1206 = vmatmul.msk.f32.gmra.mxu3 %vm97_vm3, %v90_v37 }
  0x3e   :  { %1185 = vmatmul.msk.f32.gmra.mxu1 %vm97_vm3, %v91_v42  ;;  %1196 = vmatmul.msk.f32.gmra.mxu2 %vm97_vm3, %v91_v42 }
  0x3f   :  { %1207 = vmatmul.msk.f32.gmra.mxu3 %vm97_vm3, %v91_v42 }
  0x81   :  { %v62_v18 = vpop.f32.mrf.mxu0 }
  0x82   :  { %v143_v19 = vpop.f32.mrf.mxu1  ;;  %v63_v21 = vadd.f32 %v1288_v16, %v62_v18 }
  0x83   :  { %v144_v22 = vadd.f32 %v1594_v17, %v143_v19 }
  0x84   :  { %v1176_v23 = vmul.f32 -1.442695, %v63_v21 }
  0x85   :  { %168 = vst.msk [vmem:[#allocation2] sm:$0xff] %vm167_vm4, %v144_v22 }
  0x86   :  { %1292 = vpow2.f32 %v1176_v23 }
  0x89   :  { %v333_v26 = vpop.f32.mrf.mxu0  ;;  %v203_v27 = vpop.f32.mrf.mxu2 }
  0x8a   :  { %v204_v29 = vadd.f32 %v1607_v24, %v203_v27  ;;  %v262_v30 = vpop.f32.mrf.mxu3 }
  0x8b   :  { %v263_v32 = vadd.f32 %v1612_v25, %v262_v30 }
  0x8c   :  { %v308_v31 = vld [vmem:[#allocation2] sm:$0xff]  ;;  %227 = vst.msk [vmem:[#allocation3] sm:$0xff] %vm167_vm4, %v204_v29  ;;  %v1293_v35 = vpop.eup %1292 }
  0x8d   :  { %v337_v33 = vadd.f32 %v333_v26, %v308_v31  ;;  %286 = vst.msk [vmem:[#allocation4] sm:$0xff] %vm167_vm4, %v263_v32  ;;  %v68_v38 = vadd.f32 1.0, %v1293_v35  ;;  %v146_v35 = vpop.f32.mrf.mxu1 }
  0x8f   :  { %v1224_v34 = vmul.f32 -1.442695, %v337_v33  ;;  %v80_v0 = vand.u32 2147483648, %v68_v38  ;;  %vm74_vm9 = vweird.f32 %v68_v38  ;;  %v78_v2 = vand.u32 2147483647, %v68_v38 }
  0x91   :  { %1294 = vpow2.f32 %v1224_v34  ;;  %v335_v36 = vpop.f32.mrf.mxu0  ;;  %v81_v13 = vor.u32 1.1754944e-38, %v80_v0  ;;  %vm79_vm12 = vcmp.eq.f32.partialorder %v78_v2, 8.507059e+37  ;;  %v206_v37 = vpop.f32.mrf.mxu2 }
  0x92   :  { %1296 = vrcp.f32 %v68_v38  ;;  %v147_v36 = vadd.f32 %v1594_v17, %v146_v35 }
  0x93   :  { %v357_v41 = vld [vmem:[#allocation3] sm:$0xff] }
  0x94   :  { %v403_v57 = vld [vmem:[#allocation4] sm:$0xff]  ;;  %169 = vst.msk [vmem:[#allocation2 + $0x8] sm:$0xff] %vm167_vm4, %v147_v36 }
  0x97   :  { %v1295_v39 = vpop.eup %1294 }
  0x98   :  { %v341_v40 = vadd.f32 1.0, %v1295_v39  ;;  %v1297_v45 = vpop.eup %1296  ;;  %v149_v39 = vpop.f32.mrf.mxu1 }
  0x99   :  { %v379_v43 = vpop.f32.mrf.mxu0  ;;  %v70_v48 = vmul.f32 %v1297_v45, %v68_v38  ;;  %vm75_vm6 = vweird.f32 %v1297_v45  ;;  %v207_v38 = vadd.f32 %v1607_v24, %v206_v37 }
  0x9a   :  { %1298 = vrcp.f32 %v341_v40  ;;  %v383_v44 = vadd.f32 %v379_v43, %v357_v41  ;;  %v353_v60 = vand.u32 2147483648, %v341_v40  ;;  %vm347_vm7 = vweird.f32 %v341_v40  ;;  %vm76_vm10 = vmor %vm74_vm9, %vm75_vm6  ;;  %v209_v41 = vpop.f32.mrf.mxu2 }
  0x9b   :  { %v71_v52 = vsub.f32 1.0, %v70_v48  ;;  %v351_v63 = vand.u32 2147483647, %v341_v40  ;;  %228 = vst.msk [vmem:[#allocation3 + $0x8] sm:$0xff] %vm167_vm4, %v207_v38  ;;  %v210_v42 = vadd.f32 %v1607_v24, %v209_v41 }
  0x9c   :  { %v1233_v46 = vmul.f32 -1.442695, %v383_v44  ;;  %v354_v5 = vor.u32 1.1754944e-38, %v353_v60 }
  0x9d   :  { %v72_v56 = vmul.f32 %v1297_v45, %v71_v52  ;;  %vm352_vm11 = vcmp.eq.f32.partialorder %v351_v63, 8.507059e+37  ;;  %229 = vst.msk [vmem:[#allocation3 + $0x10] sm:$0xff] %vm167_vm4, %v210_v42 }
  0x9e   :  { %1300 = vpow2.f32 %v1233_v46 }
  0x9f   :  { %v73_v62 = vadd.f32 %v1297_v45, %v72_v56 }
  0xa0   :  { %v1299_v47 = vpop.eup %1298  ;;  %v152_v43 = vpop.f32.mrf.mxu1 }
  0xa1   :  { %v343_v49 = vmul.f32 %v1299_v47, %v341_v40  ;;  %v381_v50 = vpop.f32.mrf.mxu0  ;;  %vm348_vm5 = vweird.f32 %v1299_v47  ;;  %v77_v12 = vsel %vm76_vm10, %v1297_v45, %v73_v62  ;;  %v150_v40 = vadd.f32 %v1594_v17, %v149_v39  ;;  %v265_v45 = vpop.f32.mrf.mxu3 }
  0xa2   :  { %vm349_vm8 = vmor %vm347_vm7, %vm348_vm5  ;;  %v1636_v19 = vsel %vm79_vm12, %v81_v13, %v77_v12  ;;  %v153_v44 = vadd.f32 %v1594_v17, %v152_v43  ;;  %v266_v46 = vadd.f32 %v1612_v25, %v265_v45 }
  0xa3   :  { %v344_v51 = vsub.f32 1.0, %v343_v49  ;;  %170 = vst.msk [vmem:[#allocation2 + $0x10] sm:$0xff] %vm167_vm4, %v150_v40 }
  0xa4   :  { %v1301_v53 = vpop.eup %1300  ;;  %171 = vst.msk [vmem:[#allocation2 + $0x18] sm:$0xff] %vm167_vm4, %v153_v44 }
  0xa5   :  { %v345_v54 = vmul.f32 %v1299_v47, %v344_v51  ;;  %v387_v55 = vadd.f32 1.0, %v1301_v53  ;;  %287 = vst.msk [vmem:[#allocation4 + $0x8] sm:$0xff] %vm167_vm4, %v266_v46 }
  0xa7   :  { %1302 = vrcp.f32 %v387_v55  ;;  %v346_v58 = vadd.f32 %v1299_v47, %v345_v54  ;;  %v399_v27 = vand.u32 2147483648, %v387_v55  ;;  %vm393_vm14 = vweird.f32 %v387_v55 }
  0xa8   :  { %v397_v28 = vand.u32 2147483647, %v387_v55  ;;  %v155_v49 = vpop.f32.mrf.mxu1 }
  0xa9   :  { %v425_v59 = vpop.f32.mrf.mxu0  ;;  %v350_v3 = vsel %vm349_vm8, %v1299_v47, %v346_v58  ;;  %v400_v30 = vor.u32 1.1754944e-38, %v399_v27  ;;  %v212_v47 = vpop.f32.mrf.mxu2  ;;  %v156_v50 = vadd.f32 %v1594_v17, %v155_v49 }
  0xaa   :  { %v429_v61 = vadd.f32 %v425_v59, %v403_v57  ;;  %v355_v15 = vsel %vm352_vm11, %v354_v5, %v350_v3  ;;  %vm398_vm0 = vcmp.eq.f32.partialorder %v397_v28, 8.507059e+37  ;;  %v213_v48 = vadd.f32 %v1607_v24, %v212_v47  ;;  %v478_v3 = vld [vmem:[#allocation3 + $0x8] sm:$0xff]  ;;  %v268_v27 = vpop.f32.mrf.mxu3 }
  0xab   :  { %v431_v21 = vmul.f32 0.0, %v355_v15  ;;  %172 = vst.msk [vmem:[#allocation2 + $0x20] sm:$0xff] %vm167_vm4, %v156_v50  ;;  %v269_v28 = vadd.f32 %v1612_v25, %v268_v27 }
  0xac   :  { %1304 = vtanh.f32 %v429_v61  ;;  %230 = vst.msk [vmem:[#allocation3 + $0x18] sm:$0xff] %vm167_vm4, %v213_v48 }
  0xad   :  { %v1303_v1 = vpop.eup %1302  ;;  %288 = vst.msk [vmem:[#allocation4 + $0x10] sm:$0xff] %vm167_vm4, %v269_v28 }
  0xae   :  { %v389_v8 = vmul.f32 %v1303_v1, %v387_v55  ;;  %vm394_vm13 = vweird.f32 %v1303_v1 }
  0xaf   :  { %vm395_vm15 = vmor %vm393_vm14, %vm394_vm13 }
  0xb0   :  { %v390_v14 = vsub.f32 1.0, %v389_v8  ;;  %v158_v53 = vpop.f32.mrf.mxu1 }
  0xb1   :  { %v427_v16 = vpop.f32.mrf.mxu0  ;;  %v215_v51 = vpop.f32.mrf.mxu2  ;;  %v159_v54 = vadd.f32 %v1594_v17, %v158_v53 }
  0xb2   :  { %v1305_v18 = vpop.eup %1304  ;;  %v391_v20 = vmul.f32 %v1303_v1, %v390_v14  ;;  %v216_v52 = vadd.f32 %v1607_v24, %v215_v51  ;;  %v271_v35 = vpop.f32.mrf.mxu3 }
  0xb3   :  { %v432_v22 = vmul.f32 %v1305_v18, %v1636_v19  ;;  %173 = vst.msk [vmem:[#allocation2 + $0x28] sm:$0xff] %vm167_vm4, %v159_v54  ;;  %v272_v37 = vadd.f32 %v1612_v25, %v271_v35 }
  0xb4   :  { %v392_v26 = vadd.f32 %v1303_v1, %v391_v20  ;;  %231 = vst.msk [vmem:[#allocation3 + $0x20] sm:$0xff] %vm167_vm4, %v216_v52 }
  0xb5   :  { %v1639_v23 = vadd.f32 %v432_v22, %v431_v21  ;;  %289 = vst.msk [vmem:[#allocation4 + $0x18] sm:$0xff] %vm167_vm4, %v272_v37 }
  0xb6   :  { %v396_v29 = vsel %vm395_vm15, %v1303_v1, %v392_v26  ;;  %v440_v1 = vld [vmem:[#allocation2 + $0x8] sm:$0xff] }
  0xb7   :  { %1306 = vtanh.f32 %v1639_v23  ;;  %437 = vst.msk [vmem:[#allocation7] sm:$0xff] %vm167_vm4, %v1639_v23  ;;  %v401_v32 = vsel %vm398_vm0, %v400_v30, %v396_v29 }
  0xb8   :  { %v161_v57 = vpop.f32.mrf.mxu1 }
  0xb9   :  { %v218_v55 = vpop.f32.mrf.mxu2  ;;  %v162_v58 = vadd.f32 %v1594_v17, %v161_v57 }
  0xba   :  { %v219_v56 = vadd.f32 %v1607_v24, %v218_v55  ;;  %v274_v49 = vpop.f32.mrf.mxu3 }
  0xbb   :  { %174 = vst.msk [vmem:[#allocation2 + $0x30] sm:$0xff] %vm167_vm4, %v162_v58  ;;  %v275_v50 = vadd.f32 %v1612_v25, %v274_v49 }
  0xbc   :  { %232 = vst.msk [vmem:[#allocation3 + $0x28] sm:$0xff] %vm167_vm4, %v219_v56 }
  0xbd   :  { %v1307_v31 = vpop.eup %1306  ;;  %290 = vst.msk [vmem:[#allocation4 + $0x20] sm:$0xff] %vm167_vm4, %v275_v50 }
  0xbe   :  { %v435_v33 = vmul.f32 %v1307_v31, %v401_v32 }
  0xc0   :  { %436 = vst.msk [vmem:[#allocation5] sm:$0xff] %vm167_vm4, %v435_v33  ;;  %v438_v34 = vpack.c.bf16 %v435_v33, %v435_v33  ;;  %v164_v61 = vpop.f32.mrf.mxu1 }
  0xc1   :  { %v221_v59 = vpop.f32.mrf.mxu2  ;;  %v165_v62 = vadd.f32 %v1594_v17, %v164_v61 }
  0xc2   :  { %1242 = vmatmul.msk.bf16.vlgmr.msra.gmra.mxu0 %vm167_vm4, %v438_v34  ;;  %1244 = vmatmul.msk.bf16.vlgmr.msrb.gmra.mxu1 %vm167_vm4, %v438_v34  ;;  %v222_v60 = vadd.f32 %v1607_v24, %v221_v59  ;;  %v277_v56 = vpop.f32.mrf.mxu3 }
  0xc3   :  { %1246 = vmatmul.msk.bf16.vlgmr.msrb.gmra.mxu2 %vm167_vm4, %v438_v34  ;;  %720 = vmatpush.bf16.msra.mxu0 %v1536_v9  ;;  %175 = vst.msk [vmem:[#allocation2 + $0x38] sm:$0xff] %vm167_vm4, %v165_v62  ;;  %v278_v57 = vadd.f32 %v1612_v25, %v277_v56 }
  0xc4   :  { %750 = vmatpush.bf16.msrb.mxu1 %v1510_v4  ;;  %785 = vmatpush.bf16.msrb.mxu2 %v1526_v7  ;;  %233 = vst.msk [vmem:[#allocation3 + $0x30] sm:$0xff] %vm167_vm4, %v222_v60 }
  0xc5   :  { %291 = vst.msk [vmem:[#allocation4 + $0x28] sm:$0xff] %vm167_vm4, %v278_v57  ;;  %v678_v57 = vld [vmem:[#allocation3 + $0x18] sm:$0xff] }
  0xc7   :  { %721 = vmatpush.bf16.msra.mxu0 %v1552_v11 }
  0xc8   :  { %751 = vmatpush.bf16.msrb.mxu1 %v1520_v6  ;;  %786 = vmatpush.bf16.msrb.mxu2 %v1546_v10 }
  0xc9   :  { %v224_v63 = vpop.f32.mrf.mxu2 }
  0xca   :  { %v225_v0 = vadd.f32 %v1607_v24, %v224_v63  ;;  %v513_v24 = vld [vmem:[#allocation4 + $0x8] sm:$0xff]  ;;  %v280_v62 = vpop.f32.mrf.mxu3 }
  0xcb   :  { %v281_v63 = vadd.f32 %v1612_v25, %v280_v62 }
  0xcc   :  { %234 = vst.msk [vmem:[#allocation3 + $0x38] sm:$0xff] %vm167_vm4, %v225_v0 }
  0xcd   :  { %292 = vst.msk [vmem:[#allocation4 + $0x30] sm:$0xff] %vm167_vm4, %v281_v63 }
  0xd2   :  { %v283_v0 = vpop.f32.mrf.mxu3 }
 0x13f   :  { %v453_v2 = vpop.f32.mrf.mxu0  ;;  %v488_v5 = vpop.f32.mrf.mxu1 }
 0x140   :  { %v457_v8 = vadd.f32 %v453_v2, %v440_v1  ;;  %v492_v12 = vadd.f32 %v488_v5, %v478_v3  ;;  %v284_v1 = vadd.f32 %v1612_v25, %v283_v0  ;;  %v578_v2 = vld [vmem:[#allocation3 + $0x10] sm:$0xff] }
 0x142   :  { %v1243_v13 = vmul.f32 -1.442695, %v457_v8  ;;  %v1245_v14 = vmul.f32 -1.442695, %v492_v12  ;;  %293 = vst.msk [vmem:[#allocation4 + $0x38] sm:$0xff] %vm167_vm4, %v284_v1 }
 0x144   :  { %1308 = vpow2.f32 %v1243_v13  ;;  %v540_v13 = vld [vmem:[#allocation2 + $0x10] sm:$0xff] }
 0x145   :  { %1310 = vpow2.f32 %v1245_v14 }
 0x146   :  { %v523_v15 = vpop.f32.mrf.mxu2 }
 0x147   :  { %v455_v16 = vpop.f32.mrf.mxu0  ;;  %v490_v17 = vpop.f32.mrf.mxu1  ;;  %v527_v29 = vadd.f32 %v523_v15, %v513_v24 }
 0x14a   :  { %v1309_v18 = vpop.eup %1308 }
 0x14b   :  { %v1311_v20 = vpop.eup %1310  ;;  %v461_v21 = vadd.f32 1.0, %v1309_v18 }
 0x14c   :  { %v496_v22 = vadd.f32 1.0, %v1311_v20 }
 0x14d   :  { %1312 = vrcp.f32 %v461_v21  ;;  %v473_v36 = vand.u32 2147483648, %v461_v21  ;;  %v471_v39 = vand.u32 2147483647, %v461_v21  ;;  %vm467_vm2 = vweird.f32 %v461_v21 }
 0x14e   :  { %1314 = vrcp.f32 %v496_v22  ;;  %v525_v26 = vpop.f32.mrf.mxu2  ;;  %v508_v53 = vand.u32 2147483648, %v496_v22  ;;  %vm502_vm7 = vweird.f32 %v496_v22  ;;  %v506_v54 = vand.u32 2147483647, %v496_v22 }
 0x14f   :  { %1316 = vtanh.f32 %v527_v29  ;;  %v474_v43 = vor.u32 1.1754944e-38, %v473_v36  ;;  %vm472_vm5 = vcmp.eq.f32.partialorder %v471_v39, 8.507059e+37  ;;  %v613_v26 = vld [vmem:[#allocation4 + $0x10] sm:$0xff] }
 0x150   :  { %v509_v55 = vor.u32 1.1754944e-38, %v508_v53  ;;  %vm507_vm9 = vcmp.eq.f32.partialorder %v506_v54, 8.507059e+37 }
 0x153   :  { %v1313_v30 = vpop.eup %1312 }
 0x154   :  { %v1315_v31 = vpop.eup %1314  ;;  %v463_v32 = vmul.f32 %v1313_v30, %v461_v21  ;;  %vm468_vm1 = vweird.f32 %v1313_v30 }
 0x155   :  { %v498_v33 = vmul.f32 %v1315_v31, %v496_v22  ;;  %v1317_v42 = vpop.eup %1316  ;;  %vm469_vm3 = vmor %vm467_vm2, %vm468_vm1  ;;  %vm503_vm6 = vweird.f32 %v1315_v31 }
 0x156   :  { %v464_v34 = vsub.f32 1.0, %v463_v32  ;;  %v530_v48 = vmul.f32 %v1317_v42, %v1636_v19  ;;  %vm504_vm8 = vmor %vm502_vm7, %vm503_vm6 }
 0x157   :  { %v499_v40 = vsub.f32 1.0, %v498_v33 }
 0x158   :  { %v465_v38 = vmul.f32 %v1313_v30, %v464_v34 }
 0x159   :  { %v500_v45 = vmul.f32 %v1315_v31, %v499_v40 }
 0x15a   :  { %v466_v41 = vadd.f32 %v1313_v30, %v465_v38 }
 0x15b   :  { %v501_v52 = vadd.f32 %v1315_v31, %v500_v45 }
 0x15c   :  { %v470_v44 = vsel %vm469_vm3, %v1313_v30, %v466_v41 }
 0x15d   :  { %v475_v46 = vsel %vm472_vm5, %v474_v43, %v470_v44 }
 0x15e   :  { %v529_v47 = vmul.f32 %v475_v46, %v1639_v23  ;;  %v505_v23 = vsel %vm504_vm8, %v1315_v31, %v501_v52 }
 0x15f   :  { %v510_v59 = vsel %vm507_vm9, %v509_v55, %v505_v23  ;;  %v640_v55 = vld [vmem:[#allocation2 + $0x18] sm:$0xff] }
 0x160   :  { %v1691_v51 = vadd.f32 %v530_v48, %v529_v47 }
 0x162   :  { %1318 = vtanh.f32 %v1691_v51  ;;  %537 = vst.msk [vmem:[#allocation7 + $0x8] sm:$0xff] %vm167_vm4, %v1691_v51 }
 0x168   :  { %v1319_v58 = vpop.eup %1318 }
 0x169   :  { %v533_v60 = vmul.f32 %v1319_v58, %v510_v59 }
 0x16b   :  { %535 = vst.msk [vmem:[#allocation5 + $0x8] sm:$0xff] %vm167_vm4, %v533_v60  ;;  %v538_v61 = vpack.c.bf16 %v533_v60, %v533_v60 }
 0x16d   :  { %1247 = vmatmul.msk.bf16.vlgmr.msrb.gmra.mxu3 %vm167_vm4, %v538_v61  ;;  %1249 = vmatmul.msk.bf16.vlgmr.msrb.gmra.mxu0 %vm167_vm4, %v538_v61 }
 0x16e   :  { %1251 = vmatmul.msk.bf16.vlgmr.msra.gmra.mxu1 %vm167_vm4, %v538_v61  ;;  %820 = vmatpush.bf16.msrb.mxu3 %v1536_v9 }
 0x16f   :  { %850 = vmatpush.bf16.msrb.mxu0 %v1510_v4  ;;  %885 = vmatpush.bf16.msra.mxu1 %v1526_v7 }
 0x172   :  { %821 = vmatpush.bf16.msrb.mxu3 %v1552_v11 }
 0x173   :  { %851 = vmatpush.bf16.msrb.mxu0 %v1520_v6  ;;  %886 = vmatpush.bf16.msra.mxu1 %v1546_v10 }
 0x1ea   :  { %v588_v3 = vpop.f32.mrf.mxu0 }
 0x1eb   :  { %v592_v5 = vadd.f32 %v588_v3, %v578_v2  ;;  %v623_v8 = vpop.f32.mrf.mxu1 }
 0x1ec   :  { %v627_v27 = vadd.f32 %v623_v8, %v613_v26 }
 0x1ed   :  { %v1250_v12 = vmul.f32 -1.442695, %v592_v5 }
 0x1ef   :  { %1320 = vpow2.f32 %v1250_v12  ;;  %v713_v12 = vld [vmem:[#allocation4 + $0x18] sm:$0xff] }
 0x1f0   :  { %v553_v14 = vpop.f32.mrf.mxu3 }
 0x1f1   :  { %v557_v15 = vadd.f32 %v553_v14, %v540_v13 }
 0x1f2   :  { %v590_v16 = vpop.f32.mrf.mxu0 }
 0x1f3   :  { %v1248_v17 = vmul.f32 -1.442695, %v557_v15  ;;  %v625_v18 = vpop.f32.mrf.mxu1 }
 0x1f5   :  { %1322 = vpow2.f32 %v1248_v17  ;;  %v1321_v20 = vpop.eup %1320 }
 0x1f6   :  { %v596_v22 = vadd.f32 1.0, %v1321_v20 }
 0x1f8   :  { %v555_v21 = vpop.f32.mrf.mxu3  ;;  %1324 = vrcp.f32 %v596_v22  ;;  %v608_v47 = vand.u32 2147483648, %v596_v22  ;;  %vm602_vm15 = vweird.f32 %v596_v22  ;;  %v606_v48 = vand.u32 2147483647, %v596_v22 }
 0x1fa   :  { %v609_v50 = vor.u32 1.1754944e-38, %v608_v47  ;;  %vm607_vm1 = vcmp.eq.f32.partialorder %v606_v48, 8.507059e+37  ;;  %v778_v47 = vld [vmem:[#allocation3 + $0x20] sm:$0xff] }
 0x1fb   :  { %v1323_v24 = vpop.eup %1322 }
 0x1fc   :  { %v561_v25 = vadd.f32 1.0, %v1323_v24 }
 0x1fe   :  { %1326 = vrcp.f32 %v561_v25  ;;  %v1325_v28 = vpop.eup %1324  ;;  %v573_v33 = vand.u32 2147483648, %v561_v25  ;;  %v571_v35 = vand.u32 2147483647, %v561_v25  ;;  %vm567_vm11 = vweird.f32 %v561_v25 }
 0x1ff   :  { %v598_v31 = vmul.f32 %v1325_v28, %v596_v22  ;;  %1328 = vtanh.f32 %v627_v27  ;;  %vm603_vm14 = vweird.f32 %v1325_v28 }
 0x200   :  { %v574_v39 = vor.u32 1.1754944e-38, %v573_v33  ;;  %vm572_vm13 = vcmp.eq.f32.partialorder %v571_v35, 8.507059e+37  ;;  %vm604_vm0 = vmor %vm602_vm15, %vm603_vm14 }
 0x201   :  { %v599_v36 = vsub.f32 1.0, %v598_v31 }
 0x203   :  { %v600_v41 = vmul.f32 %v1325_v28, %v599_v36 }
 0x204   :  { %v1327_v29 = vpop.eup %1326 }
 0x205   :  { %v563_v30 = vmul.f32 %v1327_v29, %v561_v25  ;;  %vm568_vm10 = vweird.f32 %v1327_v29  ;;  %v1329_v38 = vpop.eup %1328  ;;  %v601_v46 = vadd.f32 %v1325_v28, %v600_v41 }
 0x206   :  { %vm569_vm12 = vmor %vm567_vm11, %vm568_vm10  ;;  %v630_v43 = vmul.f32 %v1329_v38, %v1636_v19 }
 0x207   :  { %v564_v32 = vsub.f32 1.0, %v563_v30  ;;  %v605_v49 = vsel %vm604_vm0, %v1325_v28, %v601_v46 }
 0x208   :  { %v610_v53 = vsel %vm607_vm1, %v609_v50, %v605_v49 }
 0x209   :  { %v565_v34 = vmul.f32 %v1327_v29, %v564_v32 }
 0x20b   :  { %v566_v37 = vadd.f32 %v1327_v29, %v565_v34 }
 0x20d   :  { %v570_v40 = vsel %vm569_vm12, %v1327_v29, %v566_v37 }
 0x20e   :  { %v575_v42 = vsel %vm572_vm13, %v574_v39, %v570_v40 }
 0x20f   :  { %v629_v44 = vmul.f32 %v575_v42, %v1691_v51 }
 0x211   :  { %v1715_v45 = vadd.f32 %v630_v43, %v629_v44  ;;  %v740_v43 = vld [vmem:[#allocation2 + $0x20] sm:$0xff] }
 0x213   :  { %637 = vst.msk [vmem:[#allocation7 + $0x10] sm:$0xff] %vm167_vm4, %v1715_v45  ;;  %1330 = vtanh.f32 %v1715_v45 }
 0x219   :  { %v1331_v52 = vpop.eup %1330 }
 0x21a   :  { %v633_v54 = vmul.f32 %v1331_v52, %v610_v53 }
 0x21c   :  { %635 = vst.msk [vmem:[#allocation5 + $0x10] sm:$0xff] %vm167_vm4, %v633_v54  ;;  %v638_v51 = vpack.c.bf16 %v633_v54, %v633_v54 }
 0x21e   :  { %1252 = vmatmul.msk.bf16.vlgmr.msra.gmra.mxu2 %vm167_vm4, %v638_v51  ;;  %1254 = vmatmul.msk.bf16.vlgmr.msra.gmra.mxu3 %vm167_vm4, %v638_v51 }
 0x21f   :  { %1256 = vmatmul.msk.bf16.vlgmr.msra.gmra.mxu0 %vm167_vm4, %v638_v51  ;;  %920 = vmatpush.bf16.msra.mxu2 %v1536_v9 }
 0x220   :  { %950 = vmatpush.bf16.msra.mxu3 %v1510_v4  ;;  %985 = vmatpush.bf16.msra.mxu0 %v1526_v7 }
 0x223   :  { %921 = vmatpush.bf16.msra.mxu2 %v1552_v11 }
 0x224   :  { %951 = vmatpush.bf16.msra.mxu3 %v1520_v6  ;;  %986 = vmatpush.bf16.msra.mxu0 %v1546_v10 }
 0x29c   :  { %v723_v23 = vpop.f32.mrf.mxu0 }
 0x29d   :  { %v727_v13 = vadd.f32 %v723_v23, %v713_v12  ;;  %v813_v23 = vld [vmem:[#allocation4 + $0x20] sm:$0xff] }
 0x2a1   :  { %v653_v56 = vpop.f32.mrf.mxu2  ;;  %v688_v58 = vpop.f32.mrf.mxu3 }
 0x2a2   :  { %v657_v59 = vadd.f32 %v653_v56, %v640_v55  ;;  %v692_v60 = vadd.f32 %v688_v58, %v678_v57 }
 0x2a4   :  { %v1253_v61 = vmul.f32 -1.442695, %v657_v59  ;;  %v1255_v62 = vmul.f32 -1.442695, %v692_v60  ;;  %v725_v63 = vpop.f32.mrf.mxu0 }
 0x2a6   :  { %1332 = vpow2.f32 %v1253_v61 }
 0x2a7   :  { %1334 = vpow2.f32 %v1255_v62 }
 0x2a9   :  { %v655_v0 = vpop.f32.mrf.mxu2  ;;  %v690_v1 = vpop.f32.mrf.mxu3 }
 0x2ac   :  { %v1333_v2 = vpop.eup %1332 }
 0x2ad   :  { %v1335_v3 = vpop.eup %1334  ;;  %v661_v5 = vadd.f32 1.0, %v1333_v2 }
 0x2ae   :  { %v696_v8 = vadd.f32 1.0, %v1335_v3 }
 0x2af   :  { %1336 = vrcp.f32 %v661_v5  ;;  %v673_v20 = vand.u32 2147483648, %v661_v5  ;;  %v671_v22 = vand.u32 2147483647, %v661_v5  ;;  %vm667_vm3 = vweird.f32 %v661_v5 }
 0x2b0   :  { %1338 = vrcp.f32 %v696_v8  ;;  %v708_v35 = vand.u32 2147483648, %v696_v8  ;;  %vm702_vm8 = vweird.f32 %v696_v8  ;;  %v706_v36 = vand.u32 2147483647, %v696_v8 }
 0x2b1   :  { %1340 = vtanh.f32 %v727_v13  ;;  %v674_v27 = vor.u32 1.1754944e-38, %v673_v20  ;;  %vm672_vm6 = vcmp.eq.f32.partialorder %v671_v22, 8.507059e+37 }
 0x2b2   :  { %v709_v38 = vor.u32 1.1754944e-38, %v708_v35  ;;  %vm707_vm10 = vcmp.eq.f32.partialorder %v706_v36, 8.507059e+37 }
 0x2b5   :  { %v1337_v14 = vpop.eup %1336 }
 0x2b6   :  { %v1339_v15 = vpop.eup %1338  ;;  %v663_v16 = vmul.f32 %v1337_v14, %v661_v5  ;;  %vm668_vm2 = vweird.f32 %v1337_v14 }
 0x2b7   :  { %v698_v17 = vmul.f32 %v1339_v15, %v696_v8  ;;  %v1341_v26 = vpop.eup %1340  ;;  %vm669_vm5 = vmor %vm667_vm3, %vm668_vm2  ;;  %vm703_vm7 = vweird.f32 %v1339_v15 }
 0x2b8   :  { %v664_v18 = vsub.f32 1.0, %v663_v16  ;;  %v730_v31 = vmul.f32 %v1341_v26, %v1636_v19  ;;  %vm704_vm9 = vmor %vm702_vm8, %vm703_vm7 }
 0x2b9   :  { %v699_v24 = vsub.f32 1.0, %v698_v17 }
 0x2ba   :  { %v665_v21 = vmul.f32 %v1337_v14, %v664_v18 }
 0x2bb   :  { %v700_v30 = vmul.f32 %v1339_v15, %v699_v24 }
 0x2bc   :  { %v666_v25 = vadd.f32 %v1337_v14, %v665_v21 }
 0x2bd   :  { %v701_v34 = vadd.f32 %v1339_v15, %v700_v30 }
 0x2be   :  { %v670_v28 = vsel %vm669_vm5, %v1337_v14, %v666_v25 }
 0x2bf   :  { %v675_v29 = vsel %vm672_vm6, %v674_v27, %v670_v28  ;;  %v705_v37 = vsel %vm704_vm9, %v1339_v15, %v701_v34  ;;  %v840_v27 = vld [vmem:[#allocation2 + $0x28] sm:$0xff] }
 0x2c0   :  { %v729_v32 = vmul.f32 %v675_v29, %v1715_v45  ;;  %v710_v40 = vsel %vm707_vm10, %v709_v38, %v705_v37  ;;  %v878_v29 = vld [vmem:[#allocation3 + $0x28] sm:$0xff] }
 0x2c2   :  { %v1732_v33 = vadd.f32 %v730_v31, %v729_v32 }
 0x2c4   :  { %737 = vst.msk [vmem:[#allocation7 + $0x18] sm:$0xff] %vm167_vm4, %v1732_v33  ;;  %1342 = vtanh.f32 %v1732_v33 }
 0x2ca   :  { %v1343_v39 = vpop.eup %1342 }
 0x2cb   :  { %v733_v41 = vmul.f32 %v1343_v39, %v710_v40 }
 0x2cd   :  { %735 = vst.msk [vmem:[#allocation5 + $0x18] sm:$0xff] %vm167_vm4, %v733_v41  ;;  %v738_v42 = vpack.c.bf16 %v733_v41, %v733_v41 }
 0x2cf   :  { %1257 = vmatmul.msk.bf16.vlgmr.msrb.gmra.mxu1 %vm167_vm4, %v738_v42  ;;  %1259 = vmatmul.msk.bf16.vlgmr.msrb.gmra.mxu2 %vm167_vm4, %v738_v42 }
 0x2d0   :  { %1261 = vmatmul.msk.bf16.vlgmr.msrb.gmra.mxu3 %vm167_vm4, %v738_v42  ;;  %1020 = vmatpush.bf16.msrb.mxu1 %v1536_v9 }
 0x2d1   :  { %1050 = vmatpush.bf16.msrb.mxu2 %v1510_v4  ;;  %1085 = vmatpush.bf16.msrb.mxu3 %v1526_v7 }
 0x2d4   :  { %1021 = vmatpush.bf16.msrb.mxu1 %v1552_v11 }
 0x2d5   :  { %1051 = vmatpush.bf16.msrb.mxu2 %v1520_v6  ;;  %1086 = vmatpush.bf16.msrb.mxu3 %v1546_v10 }
 0x34c   :  { %v753_v44 = vpop.f32.mrf.mxu1 }
 0x34d   :  { %v757_v45 = vadd.f32 %v753_v44, %v740_v43 }
 0x34f   :  { %v1258_v46 = vmul.f32 -1.442695, %v757_v45 }
 0x351   :  { %1344 = vpow2.f32 %v1258_v46 }
 0x352   :  { %v788_v48 = vpop.f32.mrf.mxu2 }
 0x353   :  { %v792_v49 = vadd.f32 %v788_v48, %v778_v47  ;;  %v823_v50 = vpop.f32.mrf.mxu3 }
 0x354   :  { %v755_v52 = vpop.f32.mrf.mxu1  ;;  %v827_v55 = vadd.f32 %v823_v50, %v813_v23 }
 0x355   :  { %v1260_v53 = vmul.f32 -1.442695, %v792_v49 }
 0x357   :  { %v1345_v4 = vpop.eup %1344  ;;  %1346 = vpow2.f32 %v1260_v53 }
 0x358   :  { %v761_v7 = vadd.f32 1.0, %v1345_v4 }
 0x35a   :  { %1348 = vrcp.f32 %v761_v7  ;;  %v790_v54 = vpop.f32.mrf.mxu2  ;;  %v773_v59 = vand.u32 2147483648, %v761_v7  ;;  %v771_v61 = vand.u32 2147483647, %v761_v7  ;;  %vm767_vm12 = vweird.f32 %v761_v7 }
 0x35b   :  { %v825_v51 = vpop.f32.mrf.mxu3 }
 0x35c   :  { %v774_v2 = vor.u32 1.1754944e-38, %v773_v59  ;;  %vm772_vm14 = vcmp.eq.f32.partialorder %v771_v61, 8.507059e+37 }
 0x35d   :  { %v1347_v6 = vpop.eup %1346 }
 0x35e   :  { %v796_v10 = vadd.f32 1.0, %v1347_v6 }
 0x360   :  { %v1349_v56 = vpop.eup %1348  ;;  %1350 = vrcp.f32 %v796_v10  ;;  %v808_v17 = vand.u32 2147483648, %v796_v10  ;;  %vm802_vm0 = vweird.f32 %v796_v10  ;;  %v806_v18 = vand.u32 2147483647, %v796_v10 }
 0x361   :  { %v763_v57 = vmul.f32 %v1349_v56, %v761_v7  ;;  %1352 = vtanh.f32 %v827_v55  ;;  %vm768_vm11 = vweird.f32 %v1349_v56 }
 0x362   :  { %vm769_vm13 = vmor %vm767_vm12, %vm768_vm11  ;;  %v809_v21 = vor.u32 1.1754944e-38, %v808_v17  ;;  %vm807_vm2 = vcmp.eq.f32.partialorder %v806_v18, 8.507059e+37 }
 0x363   :  { %v764_v58 = vsub.f32 1.0, %v763_v57 }
 0x365   :  { %v765_v60 = vmul.f32 %v1349_v56, %v764_v58 }
 0x366   :  { %v1351_v62 = vpop.eup %1350 }
 0x367   :  { %v798_v63 = vmul.f32 %v1351_v62, %v796_v10  ;;  %v766_v0 = vadd.f32 %v1349_v56, %v765_v60  ;;  %v1353_v1 = vpop.eup %1352  ;;  %vm803_vm15 = vweird.f32 %v1351_v62 }
 0x368   :  { %v830_v14 = vmul.f32 %v1353_v1, %v1636_v19  ;;  %vm804_vm1 = vmor %vm802_vm0, %vm803_vm15  ;;  %v978_v1 = vld [vmem:[#allocation3 + $0x30] sm:$0xff] }
 0x369   :  { %v799_v3 = vsub.f32 1.0, %v798_v63  ;;  %v770_v5 = vsel %vm769_vm13, %v1349_v56, %v766_v0 }
 0x36a   :  { %v775_v8 = vsel %vm772_vm14, %v774_v2, %v770_v5 }
 0x36b   :  { %v800_v12 = vmul.f32 %v1351_v62, %v799_v3  ;;  %v829_v13 = vmul.f32 %v775_v8, %v1732_v33 }
 0x36d   :  { %v1749_v15 = vadd.f32 %v830_v14, %v829_v13  ;;  %v801_v16 = vadd.f32 %v1351_v62, %v800_v12  ;;  %v940_v12 = vld [vmem:[#allocation2 + $0x30] sm:$0xff] }
 0x36f   :  { %1354 = vtanh.f32 %v1749_v15  ;;  %837 = vst.msk [vmem:[#allocation7 + $0x20] sm:$0xff] %vm167_vm4, %v1749_v15  ;;  %v805_v20 = vsel %vm804_vm1, %v1351_v62, %v801_v16 }
 0x370   :  { %v810_v24 = vsel %vm807_vm2, %v809_v21, %v805_v20 }
 0x375   :  { %v1355_v22 = vpop.eup %1354 }
 0x376   :  { %v833_v25 = vmul.f32 %v1355_v22, %v810_v24 }
 0x378   :  { %835 = vst.msk [vmem:[#allocation5 + $0x20] sm:$0xff] %vm167_vm4, %v833_v25  ;;  %v838_v26 = vpack.c.bf16 %v833_v25, %v833_v25  ;;  %v1013_v25 = vld [vmem:[#allocation4 + $0x30] sm:$0xff] }
 0x37a   :  { %1262 = vmatmul.msk.bf16.vlgmr.msrb.gmra.mxu0 %vm167_vm4, %v838_v26  ;;  %1264 = vmatmul.msk.bf16.vlgmr.msra.gmra.mxu1 %vm167_vm4, %v838_v26 }
 0x37b   :  { %1266 = vmatmul.msk.bf16.vlgmr.msra.gmra.mxu2 %vm167_vm4, %v838_v26  ;;  %1120 = vmatpush.bf16.msrb.mxu0 %v1536_v9 }
 0x37f   :  { %1121 = vmatpush.bf16.msrb.mxu0 %v1552_v11  ;;  %v913_v11 = vld [vmem:[#allocation4 + $0x28] sm:$0xff] }
 0x3f7   :  { %v853_v28 = vpop.f32.mrf.mxu0  ;;  %v888_v30 = vpop.f32.mrf.mxu1 }
 0x3f8   :  { %v857_v31 = vadd.f32 %v853_v28, %v840_v27  ;;  %v892_v32 = vadd.f32 %v888_v30, %v878_v29 }
 0x3fa   :  { %v1263_v33 = vmul.f32 -1.442695, %v857_v31  ;;  %v1265_v34 = vmul.f32 -1.442695, %v892_v32 }
 0x3fc   :  { %1356 = vpow2.f32 %v1263_v33 }
 0x3fd   :  { %1358 = vpow2.f32 %v1265_v34 }
 0x3fe   :  { %v923_v35 = vpop.f32.mrf.mxu2 }
 0x3ff   :  { %v855_v36 = vpop.f32.mrf.mxu0  ;;  %v890_v37 = vpop.f32.mrf.mxu1  ;;  %v927_v42 = vadd.f32 %v923_v35, %v913_v11 }
 0x402   :  { %v1357_v38 = vpop.eup %1356 }
 0x403   :  { %v1359_v39 = vpop.eup %1358  ;;  %v861_v40 = vadd.f32 1.0, %v1357_v38 }
 0x404   :  { %v896_v41 = vadd.f32 1.0, %v1359_v39 }
 0x405   :  { %1360 = vrcp.f32 %v861_v40  ;;  %v873_v48 = vand.u32 2147483648, %v861_v40  ;;  %v871_v50 = vand.u32 2147483647, %v861_v40  ;;  %vm867_vm5 = vweird.f32 %v861_v40 }
 0x406   :  { %1362 = vrcp.f32 %v896_v41  ;;  %v925_v9 = vpop.f32.mrf.mxu2  ;;  %v908_v57 = vand.u32 2147483648, %v896_v41  ;;  %vm902_vm9 = vweird.f32 %v896_v41  ;;  %v906_v58 = vand.u32 2147483647, %v896_v41 }
 0x407   :  { %1364 = vtanh.f32 %v927_v42  ;;  %v874_v7 = vor.u32 1.1754944e-38, %v873_v48  ;;  %vm872_vm7 = vcmp.eq.f32.partialorder %v871_v50, 8.507059e+37 }
 0x408   :  { %v909_v60 = vor.u32 1.1754944e-38, %v908_v57  ;;  %vm907_vm11 = vcmp.eq.f32.partialorder %v906_v58, 8.507059e+37 }
 0x40b   :  { %v1361_v43 = vpop.eup %1360 }
 0x40c   :  { %v1363_v44 = vpop.eup %1362  ;;  %v863_v45 = vmul.f32 %v1361_v43, %v861_v40  ;;  %vm868_vm3 = vweird.f32 %v1361_v43 }
 0x40d   :  { %v898_v46 = vmul.f32 %v1363_v44, %v896_v41  ;;  %v1365_v4 = vpop.eup %1364  ;;  %vm869_vm6 = vmor %vm867_vm5, %vm868_vm3  ;;  %vm903_vm8 = vweird.f32 %v1363_v44 }
 0x40e   :  { %v864_v47 = vsub.f32 1.0, %v863_v45  ;;  %v930_v10 = vmul.f32 %v1365_v4, %v1636_v19  ;;  %vm904_vm10 = vmor %vm902_vm9, %vm903_vm8  ;;  %v1040_v4 = vld [vmem:[#allocation2 + $0x38] sm:$0xff] }
 0x40f   :  { %v899_v52 = vsub.f32 1.0, %v898_v46 }
 0x410   :  { %v865_v49 = vmul.f32 %v1361_v43, %v864_v47 }
 0x411   :  { %v900_v51 = vmul.f32 %v1363_v44, %v899_v52 }
 0x412   :  { %v866_v53 = vadd.f32 %v1361_v43, %v865_v49 }
 0x413   :  { %v901_v56 = vadd.f32 %v1363_v44, %v900_v51 }
 0x414   :  { %v870_v54 = vsel %vm869_vm6, %v1361_v43, %v866_v53 }
 0x415   :  { %v875_v6 = vsel %vm872_vm7, %v874_v7, %v870_v54  ;;  %v905_v59 = vsel %vm904_vm10, %v1363_v44, %v901_v56  ;;  %v1078_v54 = vld [vmem:[#allocation3 + $0x38] sm:$0xff] }
 0x416   :  { %v929_v23 = vmul.f32 %v875_v6, %v1749_v15  ;;  %v910_v62 = vsel %vm907_vm11, %v909_v60, %v905_v59 }
 0x418   :  { %v1762_v55 = vadd.f32 %v930_v10, %v929_v23 }
 0x41a   :  { %1366 = vtanh.f32 %v1762_v55  ;;  %937 = vst.msk [vmem:[#allocation7 + $0x28] sm:$0xff] %vm167_vm4, %v1762_v55 }
 0x420   :  { %v1367_v61 = vpop.eup %1366 }
 0x421   :  { %v933_v63 = vmul.f32 %v1367_v61, %v910_v62 }
 0x423   :  { %935 = vst.msk [vmem:[#allocation5 + $0x28] sm:$0xff] %vm167_vm4, %v933_v63  ;;  %v938_v0 = vpack.c.bf16 %v933_v63, %v933_v63  ;;  %v1113_v63 = vld [vmem:[#allocation4 + $0x38] sm:$0xff] }
 0x425   :  { %1267 = vmatmul.msk.bf16.vlgmr.msra.gmra.mxu3 %vm167_vm4, %v938_v0  ;;  %1269 = vmatmul.msk.bf16.vlgmr.msra.gmra.mxu0 %vm167_vm4, %v938_v0 }
 0x426   :  { %1271 = vmatmul.msk.bf16.vlgmr.msrb.gmra.mxu1 %vm167_vm4, %v938_v0 }
 0x4a2   :  { %v988_v2 = vpop.f32.mrf.mxu0 }
 0x4a3   :  { %v992_v3 = vadd.f32 %v988_v2, %v978_v1  ;;  %v1023_v5 = vpop.f32.mrf.mxu1 }
 0x4a4   :  { %v1027_v26 = vadd.f32 %v1023_v5, %v1013_v25 }
 0x4a5   :  { %v1270_v8 = vmul.f32 -1.442695, %v992_v3 }
 0x4a7   :  { %1368 = vpow2.f32 %v1270_v8 }
 0x4a8   :  { %v953_v13 = vpop.f32.mrf.mxu3 }
 0x4a9   :  { %v957_v14 = vadd.f32 %v953_v13, %v940_v12 }
 0x4aa   :  { %v990_v15 = vpop.f32.mrf.mxu0 }
 0x4ab   :  { %v1268_v16 = vmul.f32 -1.442695, %v957_v14  ;;  %v1025_v17 = vpop.f32.mrf.mxu1 }
 0x4ad   :  { %1370 = vpow2.f32 %v1268_v16  ;;  %v1369_v18 = vpop.eup %1368 }
 0x4ae   :  { %v996_v21 = vadd.f32 1.0, %v1369_v18 }
 0x4b0   :  { %v955_v20 = vpop.f32.mrf.mxu3  ;;  %1372 = vrcp.f32 %v996_v21  ;;  %v1008_v44 = vand.u32 2147483648, %v996_v21  ;;  %vm1002_vm1 = vweird.f32 %v996_v21  ;;  %v1006_v45 = vand.u32 2147483647, %v996_v21 }
 0x4b2   :  { %v1009_v47 = vor.u32 1.1754944e-38, %v1008_v44  ;;  %vm1007_vm3 = vcmp.eq.f32.partialorder %v1006_v45, 8.507059e+37 }
 0x4b3   :  { %v1371_v22 = vpop.eup %1370 }
 0x4b4   :  { %v961_v24 = vadd.f32 1.0, %v1371_v22 }
 0x4b6   :  { %1374 = vrcp.f32 %v961_v24  ;;  %v1373_v27 = vpop.eup %1372  ;;  %v973_v32 = vand.u32 2147483648, %v961_v24  ;;  %v971_v34 = vand.u32 2147483647, %v961_v24  ;;  %vm967_vm13 = vweird.f32 %v961_v24 }
 0x4b7   :  { %v998_v30 = vmul.f32 %v1373_v27, %v996_v21  ;;  %1376 = vtanh.f32 %v1027_v26  ;;  %vm1003_vm0 = vweird.f32 %v1373_v27 }
 0x4b8   :  { %v974_v38 = vor.u32 1.1754944e-38, %v973_v32  ;;  %vm972_vm15 = vcmp.eq.f32.partialorder %v971_v34, 8.507059e+37  ;;  %vm1004_vm2 = vmor %vm1002_vm1, %vm1003_vm0 }
 0x4b9   :  { %v999_v35 = vsub.f32 1.0, %v998_v30 }
 0x4bb   :  { %v1000_v40 = vmul.f32 %v1373_v27, %v999_v35 }
 0x4bc   :  { %v1375_v28 = vpop.eup %1374 }
 0x4bd   :  { %v963_v29 = vmul.f32 %v1375_v28, %v961_v24  ;;  %vm968_vm12 = vweird.f32 %v1375_v28  ;;  %v1377_v37 = vpop.eup %1376  ;;  %v1001_v43 = vadd.f32 %v1373_v27, %v1000_v40 }
 0x4be   :  { %vm969_vm14 = vmor %vm967_vm13, %vm968_vm12  ;;  %v1030_v9 = vmul.f32 %v1377_v37, %v1636_v19 }
 0x4bf   :  { %v964_v31 = vsub.f32 1.0, %v963_v29  ;;  %v1005_v46 = vsel %vm1004_vm2, %v1373_v27, %v1001_v43 }
 0x4c0   :  { %v1010_v49 = vsel %vm1007_vm3, %v1009_v47, %v1005_v46 }
 0x4c1   :  { %v965_v33 = vmul.f32 %v1375_v28, %v964_v31 }
 0x4c3   :  { %v966_v36 = vadd.f32 %v1375_v28, %v965_v33 }
 0x4c5   :  { %v970_v39 = vsel %vm969_vm14, %v1375_v28, %v966_v36 }
 0x4c6   :  { %v975_v41 = vsel %vm972_vm15, %v974_v38, %v970_v39 }
 0x4c7   :  { %v1029_v11 = vmul.f32 %v975_v41, %v1762_v55 }
 0x4c9   :  { %v1773_v42 = vadd.f32 %v1030_v9, %v1029_v11 }
 0x4cb   :  { %1037 = vst.msk [vmem:[#allocation7 + $0x30] sm:$0xff] %vm167_vm4, %v1773_v42  ;;  %1378 = vtanh.f32 %v1773_v42 }
 0x4d1   :  { %v1379_v48 = vpop.eup %1378 }
 0x4d2   :  { %v1033_v50 = vmul.f32 %v1379_v48, %v1010_v49 }
 0x4d4   :  { %1035 = vst.msk [vmem:[#allocation5 + $0x30] sm:$0xff] %vm167_vm4, %v1033_v50  ;;  %v1038_v52 = vpack.c.bf16 %v1033_v50, %v1033_v50 }
 0x4d6   :  { %1272 = vmatmul.msk.bf16.vlgmr.msrb.gmra.mxu2 %vm167_vm4, %v1038_v52  ;;  %1274 = vmatmul.msk.bf16.vlgmr.msrb.gmra.mxu3 %vm167_vm4, %v1038_v52 }
 0x4d7   :  { %1276 = vmatmul.msk.bf16.vlgmr.msrb.gmra.mxu0 %vm167_vm4, %v1038_v52 }
 0x554   :  { %v1123_v53 = vpop.f32.mrf.mxu0 }
 0x555   :  { %v1127_v0 = vadd.f32 %v1123_v53, %v1113_v63 }
 0x559   :  { %v1053_v7 = vpop.f32.mrf.mxu2  ;;  %v1088_v51 = vpop.f32.mrf.mxu3 }
 0x55a   :  { %v1057_v6 = vadd.f32 %v1053_v7, %v1040_v4  ;;  %v1092_v23 = vadd.f32 %v1088_v51, %v1078_v54 }
 0x55c   :  { %v1273_v10 = vmul.f32 -1.442695, %v1057_v6  ;;  %v1275_v55 = vmul.f32 -1.442695, %v1092_v23  ;;  %v1125_v56 = vpop.f32.mrf.mxu0 }
 0x55e   :  { %1380 = vpow2.f32 %v1273_v10 }
 0x55f   :  { %1382 = vpow2.f32 %v1275_v55 }
 0x561   :  { %v1055_v57 = vpop.f32.mrf.mxu2  ;;  %v1090_v58 = vpop.f32.mrf.mxu3 }
 0x564   :  { %v1381_v59 = vpop.eup %1380 }
 0x565   :  { %v1383_v60 = vpop.eup %1382  ;;  %v1061_v61 = vadd.f32 1.0, %v1381_v59 }
 0x566   :  { %v1096_v62 = vadd.f32 1.0, %v1383_v60 }
 0x567   :  { %1384 = vrcp.f32 %v1061_v61  ;;  %v1073_v12 = vand.u32 2147483648, %v1061_v61  ;;  %v1071_v14 = vand.u32 2147483647, %v1061_v61  ;;  %vm1067_vm6 = vweird.f32 %v1061_v61 }
 0x568   :  { %1386 = vrcp.f32 %v1096_v62  ;;  %v1108_v28 = vand.u32 2147483648, %v1096_v62  ;;  %vm1102_vm10 = vweird.f32 %v1096_v62  ;;  %v1106_v29 = vand.u32 2147483647, %v1096_v62 }
 0x569   :  { %1388 = vtanh.f32 %v1127_v0  ;;  %v1074_v18 = vor.u32 1.1754944e-38, %v1073_v12  ;;  %vm1072_vm8 = vcmp.eq.f32.partialorder %v1071_v14, 8.507059e+37 }
 0x56a   :  { %v1109_v31 = vor.u32 1.1754944e-38, %v1108_v28  ;;  %vm1107_vm12 = vcmp.eq.f32.partialorder %v1106_v29, 8.507059e+37 }
 0x56d   :  { %v1385_v1 = vpop.eup %1384 }
 0x56e   :  { %v1387_v2 = vpop.eup %1386  ;;  %v1063_v3 = vmul.f32 %v1385_v1, %v1061_v61  ;;  %vm1068_vm5 = vweird.f32 %v1385_v1 }
 0x56f   :  { %v1098_v5 = vmul.f32 %v1387_v2, %v1096_v62  ;;  %v1389_v17 = vpop.eup %1388  ;;  %vm1069_vm7 = vmor %vm1067_vm6, %vm1068_vm5  ;;  %vm1103_vm9 = vweird.f32 %v1387_v2 }
 0x570   :  { %v1064_v8 = vsub.f32 1.0, %v1063_v3  ;;  %v1130_v24 = vmul.f32 %v1389_v17, %v1636_v19  ;;  %vm1104_vm11 = vmor %vm1102_vm10, %vm1103_vm9 }
 0x571   :  { %v1099_v15 = vsub.f32 1.0, %v1098_v5 }
 0x572   :  { %v1065_v13 = vmul.f32 %v1385_v1, %v1064_v8 }
 0x573   :  { %v1100_v22 = vmul.f32 %v1387_v2, %v1099_v15 }
 0x574   :  { %v1066_v16 = vadd.f32 %v1385_v1, %v1065_v13 }
 0x575   :  { %v1101_v27 = vadd.f32 %v1387_v2, %v1100_v22 }
 0x576   :  { %v1070_v20 = vsel %vm1069_vm7, %v1385_v1, %v1066_v16 }
 0x577   :  { %v1075_v21 = vsel %vm1072_vm8, %v1074_v18, %v1070_v20  ;;  %v1105_v30 = vsel %vm1104_vm11, %v1387_v2, %v1101_v27 }
 0x578   :  { %v1129_v25 = vmul.f32 %v1075_v21, %v1773_v42  ;;  %v1110_v32 = vsel %vm1107_vm12, %v1109_v31, %v1105_v30 }
 0x57a   :  { %v1131_v26 = vadd.f32 %v1130_v24, %v1129_v25 }
 0x57c   :  { %1390 = vtanh.f32 %v1131_v26  ;;  %1137 = vst.msk [vmem:[#allocation7 + $0x38] sm:$0xff] %vm167_vm4, %v1131_v26 }
 0x57d   :  { %1163 = dma.vmem_to_hbm [thread:$0]  %s1156_s21, 1024, %s1158_s23, [#allocation8], %s1446_s24, %s1446_s24, %s1447_s25  }
 0x582   :  { %v1391_v19 = vpop.eup %1390 }
 0x583   :  { %v1133_v33 = vmul.f32 %v1391_v19, %v1110_v32 }
 0x585   :  { %1135 = vst.msk [vmem:[#allocation5 + $0x38] sm:$0xff] %vm167_vm4, %v1133_v33 }
 0x586   :  { %1150 = dma.vmem_to_hbm [thread:$0]  %s1143_s3, 1024, %s1145_s28, [#allocation6], %s1446_s24, %s1446_s24, %s1447_s25  }
 0x587   :  { %1440 = dma.done.wait [#allocation6], 1024  }
 0x588   :  { %1441 = vsyncadd [#allocation6], 4294966272 }
 0x589   :  { %1442 = dma.done.wait [#allocation8], 1024  }
 0x58a   :  { %1443 = vsyncadd [#allocation8], 4294966272 }
 0x58b   :  { %1172 = vsyncpa [#allocation6], 1 }
 0x58c   :  { %1173 = vsyncpa [#allocation8], 1 }

</bundles_post_ra>
